<compile_context>
chip_gen: v6e
topology: v6e:2x2x1
jax: 0.10.0
libtpu: 0.0.40
codegen_flags: <defaults>
</compile_context>

<pallas_src>
import functools

import jax
import jax.numpy as jnp
from jax import lax
from jax.experimental import pallas as pl
from jax.experimental.pallas import tpu as pltpu

C = 1.0                  # Poincare-ball curvature
C_SQRT = C ** 0.5
BALL_EPS = 4e-3          # float32 boundary epsilon (hypll `project`)
LANE = 128               # lane padding target
SUB = 8                  # sublane padding target


def _round_up(n, m):
    return ((n + m - 1) // m) * m


# ---------------------------------------------------------------------------
# In-kernel math helpers (operate on values, built from ops Mosaic lowers
# cleanly: exp/log/sqrt/rsqrt/tanh + pl.reciprocal).
# ---------------------------------------------------------------------------
def _asinh(x):
    s = jnp.where(x >= 0.0, 1.0, -1.0)
    a = jnp.abs(x)
    return s * jnp.log(a + jnp.sqrt(a * a + 1.0))


def _expmap0_project(v):
    """expmap at the origin followed by ball projection (projection fused:
    the mapped norm is tanh(sqrt(c)||v||)/sqrt(c), so clamp the tanh)."""
    ss = jnp.sum(v * v, axis=-1, keepdims=True)
    inv_n = lax.rsqrt(ss + 1e-30)
    n = ss * inv_n                                   # ||v||
    t = jnp.minimum(jnp.tanh(C_SQRT * n), 1.0 - BALL_EPS)
    return (t * inv_n * (1.0 / C_SQRT)) * v


def _hrelu(y):
    """HReLU = expmap0(relu(logmap0(y))), fused.

    logmap0 is a positive radial scaling, so relu(logmap0(y)) = s * relu(y)
    with s = atanh(sqrt(c)||y||)/(sqrt(c)||y||) > 0.  Only two cross-lane
    reductions (||y||, ||relu(y)||), one atanh, one tanh; projection fused."""
    ss_y = jnp.sum(y * y, axis=-1, keepdims=True)
    inv_ny = lax.rsqrt(ss_y + 1e-30)
    ny = ss_y * inv_ny
    a = jnp.minimum(C_SQRT * ny, 1.0 - 1e-7)
    ath = 0.5 * jnp.log((1.0 + a) * pl.reciprocal(1.0 - a, approx=True))  # atanh

    ry = jnp.maximum(y, 0.0)
    ss_r = jnp.sum(ry * ry, axis=-1, keepdims=True)
    inv_nr = lax.rsqrt(ss_r + 1e-30)
    nr = ss_r * inv_nr

    m_arg = ath * inv_ny * nr                        # sqrt(c) * s * ||relu(y)||
    t = jnp.minimum(jnp.tanh(m_arg), 1.0 - BALL_EPS)
    return (t * inv_nr * (1.0 / C_SQRT)) * ry


def _poincare_fc(x, z, two_zn, sc_over_zn, ch, sh):
    """Poincare fully-connected layer (HNN++ / hypll), with z column norms and
    cosh/sinh(2*sqrt(c)*r) precomputed outside the kernel."""
    ss_x = jnp.sum(x * x, axis=-1, keepdims=True)
    lam = 2.0 * pl.reciprocal(1.0 - C * ss_x, approx=True)        # (B, 1)

    xz = jnp.dot(x, z, preferred_element_type=jnp.float32)        # (B, D)
    arg = (lam * sc_over_zn * ch) * xz - (lam - 1.0) * sh
    v = two_zn * _asinh(arg)                                      # (B, D)

    # sinh(sqrt(c) v)/sqrt(c) with one exp + one approx reciprocal
    e = jnp.exp(C_SQRT * v)
    w = (0.5 / C_SQRT) * (e - pl.reciprocal(e, approx=True))

    ssw = jnp.sum(w * w, axis=-1, keepdims=True)
    denom = 1.0 + jnp.sqrt(1.0 + C * ssw)
    y = w / denom
    # ||y|| is known analytically -> projection without a second reduction
    ny = jnp.sqrt(ssw) / denom
    max_norm = (1.0 - BALL_EPS) / C_SQRT
    factor = jnp.where(ny > max_norm, max_norm / jnp.maximum(ny, 1e-15), 1.0)
    return y * factor


# ---------------------------------------------------------------------------
# Fused kernel
# ---------------------------------------------------------------------------
def _build_kernel(n_emb, n_euc, n_hyp, batch):
    def kernel(idx_ref, *refs):
        pos = 0
        emb = refs[pos:pos + n_emb]; pos += n_emb
        euc = []
        for _ in range(n_euc):
            euc.append((refs[pos], refs[pos + 1])); pos += 2
        hyp = []
        for _ in range(n_hyp):
            hyp.append(tuple(refs[pos:pos + 5])); pos += 5
        o_ref = refs[pos]; pos += 1
        h_scr = refs[pos]

        # ---- embedding gather + concat -------------------------------------
        # Each padded table already holds its embedding in its own lane range,
        # so "concat" = sum of the gathered 128-lane rows.
        h_scr[...] = jnp.zeros_like(h_scr)
        for b in range(batch):                        # tiny static loop
            row = emb[0][pl.ds(idx_ref[b, 0], 1), :]
            for i in range(1, n_emb):
                row = row + emb[i][pl.ds(idx_ref[b, i], 1), :]
            h_scr[pl.ds(b, 1), :] = row
        h = h_scr[...]                                # (B_pad, 128)

        # ---- Euclidean MLP (ReLU on all but the last layer) ----------------
        for l, (w_ref, b_ref) in enumerate(euc):
            h = jnp.dot(h, w_ref[...], preferred_element_type=jnp.float32)
            h = h + b_ref[...]
            if l < n_euc - 1:
                h = jnp.maximum(h, 0.0)

        # ---- manifold_map: exp-map at the origin ----------------------------
        h = _expmap0_project(h)

        # ---- hyperbolic MLP: (HLinear -> HReLU)* -> HLinear -----------------
        for l, (z_ref, two_zn_ref, sc_zn_ref, ch_ref, sh_ref) in enumerate(hyp):
            h = _poincare_fc(h, z_ref[...], two_zn_ref[...], sc_zn_ref[...],
                             ch_ref[...], sh_ref[...])
            if l < n_hyp - 1:
                h = _hrelu(h)

        o_ref[...] = h

    return kernel


# ---------------------------------------------------------------------------
# Parameters: logical init (PyTorch-like), then 128-lane padding + precompute.
# ---------------------------------------------------------------------------
def init_params(key, cat_features, embedding_dims, euc_hidden_dims,
                hyp_hidden_dims, output_dim):
    keys = iter(jax.random.split(key, 64))
    params = {}

    params["emb"] = [
        0.1 * jax.random.normal(next(keys), (n, d), jnp.float32)
        for n, d in zip(cat_features, embedding_dims)
    ]

    def _lin(din, dout):
        lim = 1.0 / (din ** 0.5)
        w = jax.random.uniform(next(keys), (din, dout), jnp.float32, -lim, lim)
        b = jax.random.uniform(next(keys), (1, dout), jnp.float32, -lim, lim)
        return w, b

    dims = [sum(embedding_dims)] + list(euc_hidden_dims)
    params["euc"] = [_lin(di, do) for di, do in zip(dims[:-1], dims[1:])]
    params["euc"].append(_lin(dims[-1], hyp_hidden_dims[0]))      # euc_out

    hdims = list(hyp_hidden_dims) + [output_dim]
    params["hyp"] = []
    for din, dout in zip(hdims[:-1], hdims[1:]):
        lim = 1.0 / (din ** 0.5)
        z = jax.random.uniform(next(keys), (din, dout), jnp.float32, -lim, lim)
        r = jnp.zeros((1, dout), jnp.float32)          # hypll HLinear bias init
        params["hyp"].append((z, r))
    return params


def prepare_params(params, embedding_dims):
    """Zero-pad everything to 128 lanes and precompute batch-independent terms."""
    dp = {}

    # Embedding tables: feature i occupies lanes [off_i, off_i + d_i).
    offs = [0]
    for d in embedding_dims:
        offs.append(offs[-1] + d)
    emb = []
    for i, tbl in enumerate(params["emb"]):
        n, d = tbl.shape
        t = jnp.zeros((_round_up(n, SUB), LANE), jnp.float32)
        emb.append(t.at[:n, offs[i]:offs[i] + d].set(tbl))
    dp["emb"] = emb

    euc = []
    for w, b in params["euc"]:
        din, dout = w.shape
        assert din <= LANE and dout <= LANE
        wp = jnp.zeros((LANE, LANE), jnp.float32).at[:din, :dout].set(w)
        bp = jnp.zeros((1, LANE), jnp.float32).at[:, :dout].set(b)
        euc.append((wp, bp))
    dp["euc"] = euc

    hyp = []
    for z, r in params["hyp"]:
        din, dout = z.shape
        assert din <= LANE and dout <= LANE
        zp = jnp.zeros((LANE, LANE), jnp.float32).at[:din, :dout].set(z)
        rp = jnp.zeros((1, LANE), jnp.float32).at[:, :dout].set(r)
        z_norm = jnp.sqrt(jnp.sum(zp * zp, axis=0, keepdims=True))   # (1, LANE)
        z_norm_safe = jnp.where(z_norm > 0.0, z_norm, 1.0)
        two_zn = 2.0 * z_norm / C_SQRT            # padded cols -> 0 -> v == 0
        sc_zn = C_SQRT / z_norm_safe
        two_cr = 2.0 * C_SQRT * rp
        ch = jnp.cosh(two_cr)                     # padded cols -> 1
        sh = jnp.sinh(two_cr)                     # padded cols -> 0
        hyp.append((zp, two_zn, sc_zn, ch, sh))
    dp["hyp"] = hyp
    return dp


# ---------------------------------------------------------------------------
# Forward pass: one fused pallas_call.
# ---------------------------------------------------------------------------
def hyperbolic_categorical_mlp(x_idx, dev_params, output_dim):
    B, n_cat = x_idx.shape
    B_pad = max(SUB, _round_up(B, SUB))

    n_emb = len(dev_params["emb"])
    n_euc = len(dev_params["euc"])
    n_hyp = len(dev_params["hyp"])
    assert n_emb == n_cat

    inputs = list(dev_params["emb"])
    for w, b in dev_params["euc"]:
        inputs += [w, b]
    for layer in dev_params["hyp"]:
        inputs += list(layer)

    vmem = pl.BlockSpec(memory_space=pltpu.MemorySpace.VMEM)
    smem = pl.BlockSpec(memory_space=pltpu.MemorySpace.SMEM)

    out_pad = pl.pallas_call(
        _build_kernel(n_emb, n_euc, n_hyp, B),
        out_shape=jax.ShapeDtypeStruct((B_pad, LANE), jnp.float32),
        in_specs=[smem] + [vmem] * len(inputs),
        out_specs=vmem,
        scratch_shapes=[pltpu.VMEM((B_pad, LANE), jnp.float32)],
    )(x_idx, *inputs)

    return out_pad[:B, :output_dim]


if __name__ == "__main__":
    cat_features = [5, 7, 3]        # cardinality of each categorical feature
    embedding_dims = [4, 4, 4]
    euc_hidden_dims = [32, 32]
    hyp_hidden_dims = [32, 16]
    output_dim = 8
    batch = 2

    key = jax.random.PRNGKey(0)
    pkey, xkey = jax.random.split(key)
    params = init_params(pkey, cat_features, embedding_dims,
                         euc_hidden_dims, hyp_hidden_dims, output_dim)
    dev_params = prepare_params(params, embedding_dims)

    xkeys = jax.random.split(xkey, len(cat_features))
    x = jnp.stack(
        [jax.random.randint(k, (batch,), 0, n, dtype=jnp.int32)
         for k, n in zip(xkeys, cat_features)],
        axis=-1,
    )  # (batch, n_cat) int32 categorical indices

    fwd = jax.jit(functools.partial(hyperbolic_categorical_mlp,
                                    dev_params=dev_params,
                                    output_dim=output_dim))
    out = jax.block_until_ready(fwd(x))

    assert out.shape == (batch, output_dim), out.shape
    assert jnp.all(jnp.isfinite(out))
    # Output must lie inside the Poincare ball of curvature C.
    assert jnp.all(jnp.sum(out * out, axis=-1) < 1.0 / C)
    print("KERNEL_OK")
</pallas_src>

<mosaic_0001>
module attributes {stable_mosaic.version = 11 : i64} {
  func.func @kernel(%arg0: memref<2x3xi32, #tpu.memory_space<smem>>, %arg1: memref<8x128xf32, #tpu.memory_space<vmem>>, %arg2: memref<8x128xf32, #tpu.memory_space<vmem>>, %arg3: memref<8x128xf32, #tpu.memory_space<vmem>>, %arg4: memref<128x128xf32, #tpu.memory_space<vmem>>, %arg5: memref<1x128xf32, #tpu.memory_space<vmem>>, %arg6: memref<128x128xf32, #tpu.memory_space<vmem>>, %arg7: memref<1x128xf32, #tpu.memory_space<vmem>>, %arg8: memref<128x128xf32, #tpu.memory_space<vmem>>, %arg9: memref<1x128xf32, #tpu.memory_space<vmem>>, %arg10: memref<128x128xf32, #tpu.memory_space<vmem>>, %arg11: memref<1x128xf32, #tpu.memory_space<vmem>>, %arg12: memref<1x128xf32, #tpu.memory_space<vmem>>, %arg13: memref<1x128xf32, #tpu.memory_space<vmem>>, %arg14: memref<1x128xf32, #tpu.memory_space<vmem>>, %arg15: memref<128x128xf32, #tpu.memory_space<vmem>>, %arg16: memref<1x128xf32, #tpu.memory_space<vmem>>, %arg17: memref<1x128xf32, #tpu.memory_space<vmem>>, %arg18: memref<1x128xf32, #tpu.memory_space<vmem>>, %arg19: memref<1x128xf32, #tpu.memory_space<vmem>>, %arg20: memref<8x128xf32, #tpu.memory_space<vmem>>, %arg21: memref<8x128xf32, #tpu.memory_space<vmem>>) attributes {dimension_semantics = [], scalar_prefetch = 0 : i64, scratch_operands = 1 : i64, tpu.core_type = #tpu.core_type<tc>} {
    %cst = arith.constant 0.000000e+00 : f32
    %0 = vector.broadcast %cst : f32 to vector<8x128xf32>
    %c0 = arith.constant 0 : index
    %c0_0 = arith.constant 0 : index
    %1 = vector.load %arg21[%c0, %c0_0] : memref<8x128xf32, #tpu.memory_space<vmem>>, vector<8x128xf32>
    tpu.vector_store %arg21[%c0, %c0_0], %0 {strides = array<i32>} : memref<8x128xf32, #tpu.memory_space<vmem>>, vector<8x128xf32>,
    %c0_1 = arith.constant 0 : index
    %c0_2 = arith.constant 0 : index
    %2 = memref.load %arg0[%c0_1, %c0_2] : memref<2x3xi32, #tpu.memory_space<smem>>
    %3 = arith.index_cast %2 : i32 to index
    %c0_3 = arith.constant 0 : index
    %4 = vector.load %arg1[%3, %c0_3] : memref<8x128xf32, #tpu.memory_space<vmem>>, vector<1x128xf32>
    %c0_4 = arith.constant 0 : index
    %c1 = arith.constant 1 : index
    %5 = memref.load %arg0[%c0_4, %c1] : memref<2x3xi32, #tpu.memory_space<smem>>
    %6 = arith.index_cast %5 : i32 to index
    %c0_5 = arith.constant 0 : index
    %7 = vector.load %arg2[%6, %c0_5] : memref<8x128xf32, #tpu.memory_space<vmem>>, vector<1x128xf32>
    %8 = arith.addf %4, %7 : vector<1x128xf32>
    %c0_6 = arith.constant 0 : index
    %c2 = arith.constant 2 : index
    %9 = memref.load %arg0[%c0_6, %c2] : memref<2x3xi32, #tpu.memory_space<smem>>
    %10 = arith.index_cast %9 : i32 to index
    %c0_7 = arith.constant 0 : index
    %11 = vector.load %arg3[%10, %c0_7] : memref<8x128xf32, #tpu.memory_space<vmem>>, vector<1x128xf32>
    %12 = arith.addf %8, %11 : vector<1x128xf32>
    %c0_8 = arith.constant 0 : index
    %c0_9 = arith.constant 0 : index
    %13 = vector.load %arg21[%c0_8, %c0_9] : memref<8x128xf32, #tpu.memory_space<vmem>>, vector<1x128xf32>
    tpu.vector_store %arg21[%c0_8, %c0_9], %12 {strides = array<i32>} : memref<8x128xf32, #tpu.memory_space<vmem>>, vector<1x128xf32>,
    %c1_10 = arith.constant 1 : index
    %c0_11 = arith.constant 0 : index
    %14 = memref.load %arg0[%c1_10, %c0_11] : memref<2x3xi32, #tpu.memory_space<smem>>
    %15 = arith.index_cast %14 : i32 to index
    %c0_12 = arith.constant 0 : index
    %16 = vector.load %arg1[%15, %c0_12] : memref<8x128xf32, #tpu.memory_space<vmem>>, vector<1x128xf32>
    %c1_13 = arith.constant 1 : index
    %c1_14 = arith.constant 1 : index
    %17 = memref.load %arg0[%c1_13, %c1_14] : memref<2x3xi32, #tpu.memory_space<smem>>
    %18 = arith.index_cast %17 : i32 to index
    %c0_15 = arith.constant 0 : index
    %19 = vector.load %arg2[%18, %c0_15] : memref<8x128xf32, #tpu.memory_space<vmem>>, vector<1x128xf32>
    %20 = arith.addf %16, %19 : vector<1x128xf32>
    %c1_16 = arith.constant 1 : index
    %c2_17 = arith.constant 2 : index
    %21 = memref.load %arg0[%c1_16, %c2_17] : memref<2x3xi32, #tpu.memory_space<smem>>
    %22 = arith.index_cast %21 : i32 to index
    %c0_18 = arith.constant 0 : index
    %23 = vector.load %arg3[%22, %c0_18] : memref<8x128xf32, #tpu.memory_space<vmem>>, vector<1x128xf32>
    %24 = arith.addf %20, %23 : vector<1x128xf32>
    %c1_19 = arith.constant 1 : index
    %c0_20 = arith.constant 0 : index
    %25 = vector.load %arg21[%c1_19, %c0_20] : memref<8x128xf32, #tpu.memory_space<vmem>>, vector<1x128xf32>
    tpu.vector_store %arg21[%c1_19, %c0_20], %24 {strides = array<i32>} : memref<8x128xf32, #tpu.memory_space<vmem>>, vector<1x128xf32>,
    %c0_21 = arith.constant 0 : index
    %c0_22 = arith.constant 0 : index
    %26 = vector.load %arg21[%c0_21, %c0_22] : memref<8x128xf32, #tpu.memory_space<vmem>>, vector<8x128xf32>
    %c0_23 = arith.constant 0 : index
    %c0_24 = arith.constant 0 : index
    %27 = vector.load %arg4[%c0_23, %c0_24] : memref<128x128xf32, #tpu.memory_space<vmem>>, vector<128x128xf32>
    %cst_25 = arith.constant dense<0.000000e+00> : vector<8x128xf32>
    %28 = tpu.matmul %26, %27, %cst_25 {dimension_numbers = #tpu.dot_dimension_numbers<[1], [0], [0], [1], [0, 0, 1, 1], [], []>} : vector<8x128xf32>, vector<128x128xf32>, vector<8x128xf32> -> vector<8x128xf32>
    %c0_26 = arith.constant 0 : index
    %c0_27 = arith.constant 0 : index
    %29 = vector.load %arg5[%c0_26, %c0_27] : memref<1x128xf32, #tpu.memory_space<vmem>>, vector<1x128xf32>
    %30 = vector.broadcast %29 : vector<1x128xf32> to vector<8x128xf32>
    %31 = arith.addf %28, %30 : vector<8x128xf32>
    %cst_28 = arith.constant 0.000000e+00 : f32
    %32 = vector.broadcast %cst_28 : f32 to vector<8x128xf32>
    %33 = arith.maximumf %31, %32 : vector<8x128xf32>
    %c0_29 = arith.constant 0 : index
    %c0_30 = arith.constant 0 : index
    %34 = vector.load %arg6[%c0_29, %c0_30] : memref<128x128xf32, #tpu.memory_space<vmem>>, vector<128x128xf32>
    %cst_31 = arith.constant dense<0.000000e+00> : vector<8x128xf32>
    %35 = tpu.matmul %33, %34, %cst_31 {dimension_numbers = #tpu.dot_dimension_numbers<[1], [0], [0], [1], [0, 0, 1, 1], [], []>} : vector<8x128xf32>, vector<128x128xf32>, vector<8x128xf32> -> vector<8x128xf32>
    %c0_32 = arith.constant 0 : index
    %c0_33 = arith.constant 0 : index
    %36 = vector.load %arg7[%c0_32, %c0_33] : memref<1x128xf32, #tpu.memory_space<vmem>>, vector<1x128xf32>
    %37 = vector.broadcast %36 : vector<1x128xf32> to vector<8x128xf32>
    %38 = arith.addf %35, %37 : vector<8x128xf32>
    %cst_34 = arith.constant 0.000000e+00 : f32
    %39 = vector.broadcast %cst_34 : f32 to vector<8x128xf32>
    %40 = arith.maximumf %38, %39 : vector<8x128xf32>
    %c0_35 = arith.constant 0 : index
    %c0_36 = arith.constant 0 : index
    %41 = vector.load %arg8[%c0_35, %c0_36] : memref<128x128xf32, #tpu.memory_space<vmem>>, vector<128x128xf32>
    %cst_37 = arith.constant dense<0.000000e+00> : vector<8x128xf32>
    %42 = tpu.matmul %40, %41, %cst_37 {dimension_numbers = #tpu.dot_dimension_numbers<[1], [0], [0], [1], [0, 0, 1, 1], [], []>} : vector<8x128xf32>, vector<128x128xf32>, vector<8x128xf32> -> vector<8x128xf32>
    %c0_38 = arith.constant 0 : index
    %c0_39 = arith.constant 0 : index
    %43 = vector.load %arg9[%c0_38, %c0_39] : memref<1x128xf32, #tpu.memory_space<vmem>>, vector<1x128xf32>
    %44 = vector.broadcast %43 : vector<1x128xf32> to vector<8x128xf32>
    %45 = arith.addf %42, %44 : vector<8x128xf32>
    %46 = arith.mulf %45, %45 : vector<8x128xf32>
    %cst_40 = arith.constant dense<0.000000e+00> : vector<8xf32>
    %47 = vector.multi_reduction <add>, %46, %cst_40 [1] : vector<8x128xf32> to vector<8xf32>
    %48 = vector.shape_cast %47 : vector<8xf32> to vector<8x1xf32>
    %cst_41 = arith.constant 1.000000e-30 : f32
    %49 = vector.broadcast %cst_41 : f32 to vector<8x1xf32>
    %50 = arith.addf %48, %49 : vector<8x1xf32>
    %51 = math.rsqrt %50 : vector<8x1xf32>
    %52 = arith.mulf %48, %51 : vector<8x1xf32>
    %cst_42 = arith.constant 1.000000e+00 : f32
    %53 = vector.broadcast %cst_42 : f32 to vector<8x1xf32>
    %54 = arith.mulf %53, %52 : vector<8x1xf32>
    %55 = math.tanh %54 : vector<8x1xf32>
    %cst_43 = arith.constant 0.995999991 : f32
    %56 = vector.broadcast %cst_43 : f32 to vector<8x1xf32>
    %57 = arith.minimumf %55, %56 : vector<8x1xf32>
    %58 = arith.mulf %57, %51 : vector<8x1xf32>
    %cst_44 = arith.constant 1.000000e+00 : f32
    %59 = vector.broadcast %cst_44 : f32 to vector<8x1xf32>
    %60 = arith.mulf %58, %59 : vector<8x1xf32>
    %61 = vector.broadcast %60 : vector<8x1xf32> to vector<8x128xf32>
    %62 = arith.mulf %61, %45 : vector<8x128xf32>
    %c0_45 = arith.constant 0 : index
    %c0_46 = arith.constant 0 : index
    %63 = vector.load %arg10[%c0_45, %c0_46] : memref<128x128xf32, #tpu.memory_space<vmem>>, vector<128x128xf32>
    %c0_47 = arith.constant 0 : index
    %c0_48 = arith.constant 0 : index
    %64 = vector.load %arg11[%c0_47, %c0_48] : memref<1x128xf32, #tpu.memory_space<vmem>>, vector<1x128xf32>
    %c0_49 = arith.constant 0 : index
    %c0_50 = arith.constant 0 : index
    %65 = vector.load %arg12[%c0_49, %c0_50] : memref<1x128xf32, #tpu.memory_space<vmem>>, vector<1x128xf32>
    %c0_51 = arith.constant 0 : index
    %c0_52 = arith.constant 0 : index
    %66 = vector.load %arg13[%c0_51, %c0_52] : memref<1x128xf32, #tpu.memory_space<vmem>>, vector<1x128xf32>
    %c0_53 = arith.constant 0 : index
    %c0_54 = arith.constant 0 : index
    %67 = vector.load %arg14[%c0_53, %c0_54] : memref<1x128xf32, #tpu.memory_space<vmem>>, vector<1x128xf32>
    %68 = arith.mulf %62, %62 : vector<8x128xf32>
    %cst_55 = arith.constant dense<0.000000e+00> : vector<8xf32>
    %69 = vector.multi_reduction <add>, %68, %cst_55 [1] : vector<8x128xf32> to vector<8xf32>
    %70 = vector.shape_cast %69 : vector<8xf32> to vector<8x1xf32>
    %cst_56 = arith.constant 1.000000e+00 : f32
    %71 = vector.broadcast %cst_56 : f32 to vector<8x1xf32>
    %72 = arith.mulf %71, %70 : vector<8x1xf32>
    %cst_57 = arith.constant 1.000000e+00 : f32
    %73 = vector.broadcast %cst_57 : f32 to vector<8x1xf32>
    %74 = arith.subf %73, %72 : vector<8x1xf32>
    %75 = tpu.reciprocal %74 {approx = true} : vector<8x1xf32> -> vector<8x1xf32>
    %cst_58 = arith.constant 2.000000e+00 : f32
    %76 = vector.broadcast %cst_58 : f32 to vector<8x1xf32>
    %77 = arith.mulf %76, %75 : vector<8x1xf32>
    %cst_59 = arith.constant dense<0.000000e+00> : vector<8x128xf32>
    %78 = tpu.matmul %62, %63, %cst_59 {dimension_numbers = #tpu.dot_dimension_numbers<[1], [0], [0], [1], [0, 0, 1, 1], [], []>} : vector<8x128xf32>, vector<128x128xf32>, vector<8x128xf32> -> vector<8x128xf32>
    %79 = vector.broadcast %77 : vector<8x1xf32> to vector<8x128xf32>
    %80 = vector.broadcast %65 : vector<1x128xf32> to vector<8x128xf32>
    %81 = arith.mulf %79, %80 : vector<8x128xf32>
    %82 = vector.broadcast %66 : vector<1x128xf32> to vector<8x128xf32>
    %83 = arith.mulf %81, %82 : vector<8x128xf32>
    %84 = arith.mulf %83, %78 : vector<8x128xf32>
    %cst_60 = arith.constant 1.000000e+00 : f32
    %85 = vector.broadcast %cst_60 : f32 to vector<8x1xf32>
    %86 = arith.subf %77, %85 : vector<8x1xf32>
    %87 = vector.broadcast %86 : vector<8x1xf32> to vector<8x128xf32>
    %88 = vector.broadcast %67 : vector<1x128xf32> to vector<8x128xf32>
    %89 = arith.mulf %87, %88 : vector<8x128xf32>
    %90 = arith.subf %84, %89 : vector<8x128xf32>
    %cst_61 = arith.constant 0.000000e+00 : f32
    %91 = vector.broadcast %cst_61 : f32 to vector<8x128xf32>
    %92 = arith.cmpf oge, %90, %91 : vector<8x128xf32>
    %cst_62 = arith.constant 1.000000e+00 : f32
    %cst_63 = arith.constant -1.000000e+00 : f32
    %93 = vector.broadcast %cst_62 : f32 to vector<8x128xf32>
    %94 = vector.broadcast %cst_63 : f32 to vector<8x128xf32>
    %95 = arith.select %92, %93, %94 : vector<8x128xi1>, vector<8x128xf32>
    %96 = math.absf %90 : vector<8x128xf32>
    %97 = arith.mulf %96, %96 : vector<8x128xf32>
    %cst_64 = arith.constant 1.000000e+00 : f32
    %98 = vector.broadcast %cst_64 : f32 to vector<8x128xf32>
    %99 = arith.addf %97, %98 : vector<8x128xf32>
    %100 = math.sqrt %99 : vector<8x128xf32>
    %101 = arith.addf %96, %100 : vector<8x128xf32>
    %102 = math.log %101 : vector<8x128xf32>
    %103 = arith.mulf %95, %102 : vector<8x128xf32>
    %104 = vector.broadcast %64 : vector<1x128xf32> to vector<8x128xf32>
    %105 = arith.mulf %104, %103 : vector<8x128xf32>
    %cst_65 = arith.constant 1.000000e+00 : f32
    %106 = vector.broadcast %cst_65 : f32 to vector<8x128xf32>
    %107 = arith.mulf %106, %105 : vector<8x128xf32>
    %108 = math.exp %107 : vector<8x128xf32>
    %109 = tpu.reciprocal %108 {approx = true} : vector<8x128xf32> -> vector<8x128xf32>
    %110 = arith.subf %108, %109 : vector<8x128xf32>
    %cst_66 = arith.constant 5.000000e-01 : f32
    %111 = vector.broadcast %cst_66 : f32 to vector<8x128xf32>
    %112 = arith.mulf %111, %110 : vector<8x128xf32>
    %113 = arith.mulf %112, %112 : vector<8x128xf32>
    %cst_67 = arith.constant dense<0.000000e+00> : vector<8xf32>
    %114 = vector.multi_reduction <add>, %113, %cst_67 [1] : vector<8x128xf32> to vector<8xf32>
    %115 = vector.shape_cast %114 : vector<8xf32> to vector<8x1xf32>
    %cst_68 = arith.constant 1.000000e+00 : f32
    %116 = vector.broadcast %cst_68 : f32 to vector<8x1xf32>
    %117 = arith.mulf %116, %115 : vector<8x1xf32>
    %cst_69 = arith.constant 1.000000e+00 : f32
    %118 = vector.broadcast %cst_69 : f32 to vector<8x1xf32>
    %119 = arith.addf %118, %117 : vector<8x1xf32>
    %120 = math.sqrt %119 : vector<8x1xf32>
    %cst_70 = arith.constant 1.000000e+00 : f32
    %121 = vector.broadcast %cst_70 : f32 to vector<8x1xf32>
    %122 = arith.addf %121, %120 : vector<8x1xf32>
    %123 = vector.broadcast %122 : vector<8x1xf32> to vector<8x128xf32>
    %124 = arith.divf %112, %123 : vector<8x128xf32>
    %125 = math.sqrt %115 : vector<8x1xf32>
    %126 = arith.divf %125, %122 : vector<8x1xf32>
    %cst_71 = arith.constant 0.995999991 : f32
    %127 = vector.broadcast %cst_71 : f32 to vector<8x1xf32>
    %128 = arith.cmpf ogt, %126, %127 : vector<8x1xf32>
    %cst_72 = arith.constant 1.000000e-15 : f32
    %129 = vector.broadcast %cst_72 : f32 to vector<8x1xf32>
    %130 = arith.maximumf %126, %129 : vector<8x1xf32>
    %cst_73 = arith.constant 0.995999991 : f32
    %131 = vector.broadcast %cst_73 : f32 to vector<8x1xf32>
    %132 = arith.divf %131, %130 : vector<8x1xf32>
    %cst_74 = arith.constant 1.000000e+00 : f32
    %133 = vector.broadcast %cst_74 : f32 to vector<8x1xf32>
    %134 = arith.select %128, %132, %133 : vector<8x1xi1>, vector<8x1xf32>
    %135 = vector.broadcast %134 : vector<8x1xf32> to vector<8x128xf32>
    %136 = arith.mulf %124, %135 : vector<8x128xf32>
    %137 = arith.mulf %136, %136 : vector<8x128xf32>
    %cst_75 = arith.constant dense<0.000000e+00> : vector<8xf32>
    %138 = vector.multi_reduction <add>, %137, %cst_75 [1] : vector<8x128xf32> to vector<8xf32>
    %139 = vector.shape_cast %138 : vector<8xf32> to vector<8x1xf32>
    %cst_76 = arith.constant 1.000000e-30 : f32
    %140 = vector.broadcast %cst_76 : f32 to vector<8x1xf32>
    %141 = arith.addf %139, %140 : vector<8x1xf32>
    %142 = math.rsqrt %141 : vector<8x1xf32>
    %143 = arith.mulf %139, %142 : vector<8x1xf32>
    %cst_77 = arith.constant 1.000000e+00 : f32
    %144 = vector.broadcast %cst_77 : f32 to vector<8x1xf32>
    %145 = arith.mulf %144, %143 : vector<8x1xf32>
    %cst_78 = arith.constant 0.99999988 : f32
    %146 = vector.broadcast %cst_78 : f32 to vector<8x1xf32>
    %147 = arith.minimumf %145, %146 : vector<8x1xf32>
    %cst_79 = arith.constant 1.000000e+00 : f32
    %148 = vector.broadcast %cst_79 : f32 to vector<8x1xf32>
    %149 = arith.addf %148, %147 : vector<8x1xf32>
    %cst_80 = arith.constant 1.000000e+00 : f32
    %150 = vector.broadcast %cst_80 : f32 to vector<8x1xf32>
    %151 = arith.subf %150, %147 : vector<8x1xf32>
    %152 = tpu.reciprocal %151 {approx = true} : vector<8x1xf32> -> vector<8x1xf32>
    %153 = arith.mulf %149, %152 : vector<8x1xf32>
    %154 = math.log %153 : vector<8x1xf32>
    %cst_81 = arith.constant 5.000000e-01 : f32
    %155 = vector.broadcast %cst_81 : f32 to vector<8x1xf32>
    %156 = arith.mulf %155, %154 : vector<8x1xf32>
    %cst_82 = arith.constant 0.000000e+00 : f32
    %157 = vector.broadcast %cst_82 : f32 to vector<8x128xf32>
    %158 = arith.maximumf %136, %157 : vector<8x128xf32>
    %159 = arith.mulf %158, %158 : vector<8x128xf32>
    %cst_83 = arith.constant dense<0.000000e+00> : vector<8xf32>
    %160 = vector.multi_reduction <add>, %159, %cst_83 [1] : vector<8x128xf32> to vector<8xf32>
    %161 = vector.shape_cast %160 : vector<8xf32> to vector<8x1xf32>
    %cst_84 = arith.constant 1.000000e-30 : f32
    %162 = vector.broadcast %cst_84 : f32 to vector<8x1xf32>
    %163 = arith.addf %161, %162 : vector<8x1xf32>
    %164 = math.rsqrt %163 : vector<8x1xf32>
    %165 = arith.mulf %161, %164 : vector<8x1xf32>
    %166 = arith.mulf %156, %142 : vector<8x1xf32>
    %167 = arith.mulf %166, %165 : vector<8x1xf32>
    %168 = math.tanh %167 : vector<8x1xf32>
    %cst_85 = arith.constant 0.995999991 : f32
    %169 = vector.broadcast %cst_85 : f32 to vector<8x1xf32>
    %170 = arith.minimumf %168, %169 : vector<8x1xf32>
    %171 = arith.mulf %170, %164 : vector<8x1xf32>
    %cst_86 = arith.constant 1.000000e+00 : f32
    %172 = vector.broadcast %cst_86 : f32 to vector<8x1xf32>
    %173 = arith.mulf %171, %172 : vector<8x1xf32>
    %174 = vector.broadcast %173 : vector<8x1xf32> to vector<8x128xf32>
    %175 = arith.mulf %174, %158 : vector<8x128xf32>
    %c0_87 = arith.constant 0 : index
    %c0_88 = arith.constant 0 : index
    %176 = vector.load %arg15[%c0_87, %c0_88] : memref<128x128xf32, #tpu.memory_space<vmem>>, vector<128x128xf32>
    %c0_89 = arith.constant 0 : index
    %c0_90 = arith.constant 0 : index
    %177 = vector.load %arg16[%c0_89, %c0_90] : memref<1x128xf32, #tpu.memory_space<vmem>>, vector<1x128xf32>
    %c0_91 = arith.constant 0 : index
    %c0_92 = arith.constant 0 : index
    %178 = vector.load %arg17[%c0_91, %c0_92] : memref<1x128xf32, #tpu.memory_space<vmem>>, vector<1x128xf32>
    %c0_93 = arith.constant 0 : index
    %c0_94 = arith.constant 0 : index
    %179 = vector.load %arg18[%c0_93, %c0_94] : memref<1x128xf32, #tpu.memory_space<vmem>>, vector<1x128xf32>
    %c0_95 = arith.constant 0 : index
    %c0_96 = arith.constant 0 : index
    %180 = vector.load %arg19[%c0_95, %c0_96] : memref<1x128xf32, #tpu.memory_space<vmem>>, vector<1x128xf32>
    %181 = arith.mulf %175, %175 : vector<8x128xf32>
    %cst_97 = arith.constant dense<0.000000e+00> : vector<8xf32>
    %182 = vector.multi_reduction <add>, %181, %cst_97 [1] : vector<8x128xf32> to vector<8xf32>
    %183 = vector.shape_cast %182 : vector<8xf32> to vector<8x1xf32>
    %cst_98 = arith.constant 1.000000e+00 : f32
    %184 = vector.broadcast %cst_98 : f32 to vector<8x1xf32>
    %185 = arith.mulf %184, %183 : vector<8x1xf32>
    %cst_99 = arith.constant 1.000000e+00 : f32
    %186 = vector.broadcast %cst_99 : f32 to vector<8x1xf32>
    %187 = arith.subf %186, %185 : vector<8x1xf32>
    %188 = tpu.reciprocal %187 {approx = true} : vector<8x1xf32> -> vector<8x1xf32>
    %cst_100 = arith.constant 2.000000e+00 : f32
    %189 = vector.broadcast %cst_100 : f32 to vector<8x1xf32>
    %190 = arith.mulf %189, %188 : vector<8x1xf32>
    %cst_101 = arith.constant dense<0.000000e+00> : vector<8x128xf32>
    %191 = tpu.matmul %175, %176, %cst_101 {dimension_numbers = #tpu.dot_dimension_numbers<[1], [0], [0], [1], [0, 0, 1, 1], [], []>} : vector<8x128xf32>, vector<128x128xf32>, vector<8x128xf32> -> vector<8x128xf32>
    %192 = vector.broadcast %190 : vector<8x1xf32> to vector<8x128xf32>
    %193 = vector.broadcast %178 : vector<1x128xf32> to vector<8x128xf32>
    %194 = arith.mulf %192, %193 : vector<8x128xf32>
    %195 = vector.broadcast %179 : vector<1x128xf32> to vector<8x128xf32>
    %196 = arith.mulf %194, %195 : vector<8x128xf32>
    %197 = arith.mulf %196, %191 : vector<8x128xf32>
    %cst_102 = arith.constant 1.000000e+00 : f32
    %198 = vector.broadcast %cst_102 : f32 to vector<8x1xf32>
    %199 = arith.subf %190, %198 : vector<8x1xf32>
    %200 = vector.broadcast %199 : vector<8x1xf32> to vector<8x128xf32>
    %201 = vector.broadcast %180 : vector<1x128xf32> to vector<8x128xf32>
    %202 = arith.mulf %200, %201 : vector<8x128xf32>
    %203 = arith.subf %197, %202 : vector<8x128xf32>
    %cst_103 = arith.constant 0.000000e+00 : f32
    %204 = vector.broadcast %cst_103 : f32 to vector<8x128xf32>
    %205 = arith.cmpf oge, %203, %204 : vector<8x128xf32>
    %cst_104 = arith.constant 1.000000e+00 : f32
    %cst_105 = arith.constant -1.000000e+00 : f32
    %206 = vector.broadcast %cst_104 : f32 to vector<8x128xf32>
    %207 = vector.broadcast %cst_105 : f32 to vector<8x128xf32>
    %208 = arith.select %205, %206, %207 : vector<8x128xi1>, vector<8x128xf32>
    %209 = math.absf %203 : vector<8x128xf32>
    %210 = arith.mulf %209, %209 : vector<8x128xf32>
    %cst_106 = arith.constant 1.000000e+00 : f32
    %211 = vector.broadcast %cst_106 : f32 to vector<8x128xf32>
    %212 = arith.addf %210, %211 : vector<8x128xf32>
    %213 = math.sqrt %212 : vector<8x128xf32>
    %214 = arith.addf %209, %213 : vector<8x128xf32>
    %215 = math.log %214 : vector<8x128xf32>
    %216 = arith.mulf %208, %215 : vector<8x128xf32>
    %217 = vector.broadcast %177 : vector<1x128xf32> to vector<8x128xf32>
    %218 = arith.mulf %217, %216 : vector<8x128xf32>
    %cst_107 = arith.constant 1.000000e+00 : f32
    %219 = vector.broadcast %cst_107 : f32 to vector<8x128xf32>
    %220 = arith.mulf %219, %218 : vector<8x128xf32>
    %221 = math.exp %220 : vector<8x128xf32>
    %222 = tpu.reciprocal %221 {approx = true} : vector<8x128xf32> -> vector<8x128xf32>
    %223 = arith.subf %221, %222 : vector<8x128xf32>
    %cst_108 = arith.constant 5.000000e-01 : f32
    %224 = vector.broadcast %cst_108 : f32 to vector<8x128xf32>
    %225 = arith.mulf %224, %223 : vector<8x128xf32>
    %226 = arith.mulf %225, %225 : vector<8x128xf32>
    %cst_109 = arith.constant dense<0.000000e+00> : vector<8xf32>
    %227 = vector.multi_reduction <add>, %226, %cst_109 [1] : vector<8x128xf32> to vector<8xf32>
    %228 = vector.shape_cast %227 : vector<8xf32> to vector<8x1xf32>
    %cst_110 = arith.constant 1.000000e+00 : f32
    %229 = vector.broadcast %cst_110 : f32 to vector<8x1xf32>
    %230 = arith.mulf %229, %228 : vector<8x1xf32>
    %cst_111 = arith.constant 1.000000e+00 : f32
    %231 = vector.broadcast %cst_111 : f32 to vector<8x1xf32>
    %232 = arith.addf %231, %230 : vector<8x1xf32>
    %233 = math.sqrt %232 : vector<8x1xf32>
    %cst_112 = arith.constant 1.000000e+00 : f32
    %234 = vector.broadcast %cst_112 : f32 to vector<8x1xf32>
    %235 = arith.addf %234, %233 : vector<8x1xf32>
    %236 = vector.broadcast %235 : vector<8x1xf32> to vector<8x128xf32>
    %237 = arith.divf %225, %236 : vector<8x128xf32>
    %238 = math.sqrt %228 : vector<8x1xf32>
    %239 = arith.divf %238, %235 : vector<8x1xf32>
    %cst_113 = arith.constant 0.995999991 : f32
    %240 = vector.broadcast %cst_113 : f32 to vector<8x1xf32>
    %241 = arith.cmpf ogt, %239, %240 : vector<8x1xf32>
    %cst_114 = arith.constant 1.000000e-15 : f32
    %242 = vector.broadcast %cst_114 : f32 to vector<8x1xf32>
    %243 = arith.maximumf %239, %242 : vector<8x1xf32>
    %cst_115 = arith.constant 0.995999991 : f32
    %244 = vector.broadcast %cst_115 : f32 to vector<8x1xf32>
    %245 = arith.divf %244, %243 : vector<8x1xf32>
    %cst_116 = arith.constant 1.000000e+00 : f32
    %246 = vector.broadcast %cst_116 : f32 to vector<8x1xf32>
    %247 = arith.select %241, %245, %246 : vector<8x1xi1>, vector<8x1xf32>
    %248 = vector.broadcast %247 : vector<8x1xf32> to vector<8x128xf32>
    %249 = arith.mulf %237, %248 : vector<8x128xf32>
    %c0_117 = arith.constant 0 : index
    %c0_118 = arith.constant 0 : index
    %250 = vector.load %arg20[%c0_117, %c0_118] : memref<8x128xf32, #tpu.memory_space<vmem>>, vector<8x128xf32>
    tpu.vector_store %arg20[%c0_117, %c0_118], %249 {strides = array<i32>} : memref<8x128xf32, #tpu.memory_space<vmem>>, vector<8x128xf32>,
    return
  }
}

</mosaic_0001>

<bundles_post_ra>
// kernel: hyperbolic_categorical_mlp.1
= control target key start
LH: loop header
LB: loop body
LE: loop exit
PB: predicated region body
PF: predicated region fallthrough
CT: control target
= control target key end

     0   :  { %s1730_s0 = inlined_call_operand.vmem [shape: s32[2,3], index: 0, kind: input, shape index: {}]   ;;  %s1731_s1 = inlined_call_operand.hbm [shape: f32[8,128], index: 1, kind: input, shape index: {}]   ;;  %s1732_s2 = inlined_call_operand.hbm [shape: f32[8,128], index: 2, kind: input, shape index: {}]   ;;  %s1733_s3 = inlined_call_operand.vmem [shape: f32[8,128], index: 3, kind: input, shape index: {}]   ;;  %s1734_s4 = inlined_call_operand.hbm [shape: f32[128,128], index: 4, kind: input, shape index: {}]   ;;  %s1735_s5 = inlined_call_operand.hbm [shape: f32[1,128], index: 5, kind: input, shape index: {}]   ;;  %s1736_s6 = inlined_call_operand.hbm [shape: f32[128,128], index: 6, kind: input, shape index: {}]   ;;  %s1737_s7 = inlined_call_operand.vmem [shape: f32[1,128], index: 7, kind: input, shape index: {}]   ;;  %s1738_s8 = inlined_call_operand.hbm [shape: f32[128,128], index: 8, kind: input, shape index: {}]   ;;  %s1739_s9 = inlined_call_operand.vmem [shape: f32[1,128], index: 9, kind: input, shape index: {}]   ;;  %s1740_s10 = inlined_call_operand.hbm [shape: f32[128,128], index: 10, kind: input, shape index: {}]   ;;  %s1741_s11 = inlined_call_operand.vmem [shape: f32[1,128], index: 11, kind: input, shape index: {}]   ;;  %s1742_s12 = inlined_call_operand.vmem [shape: f32[1,128], index: 12, kind: input, shape index: {}]   ;;  %s1743_s13 = inlined_call_operand.vmem [shape: f32[1,128], index: 13, kind: input, shape index: {}, may-alias: {13,18}]   ;;  %s1744_s14 = inlined_call_operand.vmem [shape: f32[1,128], index: 14, kind: input, shape index: {}, may-alias: {14,19}]   ;;  %s1745_s15 = inlined_call_operand.hbm [shape: f32[128,128], index: 15, kind: input, shape index: {}]   ;;  %s1746_s16 = inlined_call_operand.vmem [shape: f32[1,128], index: 16, kind: input, shape index: {}]   ;;  %s1747_s17 = inlined_call_operand.vmem [shape: f32[1,128], index: 17, kind: input, shape index: {}]   ;;  %s1748_s18 = inlined_call_operand.vmem [shape: f32[1,128], index: 18, kind: input, shape index: {}, may-alias: {13,18}]   ;;  %s1749_s19 = inlined_call_operand.vmem [shape: f32[1,128], index: 19, kind: input, shape index: {}, may-alias: {14,19}]   ;;  %s1750_s20 = inlined_call_operand.vmem [shape: f32[8,128], index: 20, kind: output, shape index: {}]  }
   0x1   :  { %1752 = sst [smem:[#allocation24_spill]] %s1730_s0 }
   0x2   :  { %1753 = sst [smem:[#allocation25_spill]] %s1731_s1 }
   0x3   :  { %1754 = sst [smem:[#allocation26_spill]] %s1732_s2 }
   0x4   :  { %1755 = sst [smem:[#allocation27_spill]] %s1733_s3 }
   0x5   :  { %1756 = sst [smem:[#allocation28_spill]] %s1734_s4 }
   0x6   :  { %25 = vsyncpa [#allocation5], 0 }
   0x7   :  { %26 = vsyncpa [#allocation4], 0 }
   0x8   :  { %27 = vsyncpa [#allocation8], 0 }
   0x9   :  { %28 = vsyncpa [#allocation11], 0 }
   0xa   :  { %29 = vsyncpa [#allocation14], 0 }
   0xb   :  { %30 = vsyncpa [#allocation17], 0  ;;  %s1420_s1 = smov [#allocation7]   ;;  %s1421_s23 = smov [#allocation10]  }
   0xc   :  { %s57_s22 = sshll.u32 %s1420_s1, 4  ;;  %s81_s24 = sshll.u32 %s1421_s23, 4  ;;  %s58_s22 = int_to_ptr.vmem [resolvable:$true] %s57_s22  ;;  %s82_s24 = int_to_ptr.vmem [resolvable:$true] %s81_s24 }
   0xd   :  { %s1244_s2 = scalar_lea.vmem %s58_s22, 128  ;;  %p1249_p1 = scmp.lt.s32.totalorder %s58_s22, %s58_s22 }
   0xe   :  { %p1245_p0 = scmp.ne.s32.totalorder %s58_s22, %s1244_s2  ;;  %p1250_p2 = scmp.lt.s32.totalorder %s1244_s2, %s1244_s2 }
  0x10   :  { %p1251_p3 = por %p1250_p2, %p1249_p1 }
  0x12   :  { %p1252_p4 = pnand %p1251_p3, %p1245_p0 }
  0x14   :  { %1255 = shalt.err (!%p1252_p4)
}
  0x15   :  { %s1757_s26 = sld [smem:[#allocation26_spill]]  ;;  %s1264_s27 = scalar_lea.vmem %s82_s24, 16 }
  0x16   :  { %p1265_p5 = scmp.ne.s32.totalorder %s82_s24, %s1264_s27  ;;  %s1268_s28 = scalar_lea.vmem %s82_s24, 32 }
  0x17   :  { %p1269_p6 = scmp.lt.s32.totalorder %s82_s24, %s82_s24  ;;  %p1270_p7 = scmp.lt.s32.totalorder %s1268_s28, %s1264_s27 }
  0x19   :  { %p1271_p8 = por %p1270_p7, %p1269_p6 }
  0x1b   :  { %60 = dma.hbm_to_vmem [thread:$0]  %s1757_s26, 128, %s58_s22, [#allocation8]  }
  0x1c   :  { %p1272_p9 = pnand %p1271_p8, %p1265_p5 }
  0x1e   :  { %1275 = shalt.err (!%p1272_p9)
}
  0x1f   :  { %84 = dma.hbm_to_vmem [thread:$0]  %s1735_s5, 16, %s82_s24, [#allocation11]  }
  0x20   :  { %s1758_s21 = sld [smem:[#allocation24_spill]]  ;;  %s1422_s23 = smov [#allocation13]  }
  0x21   :  { %s104_s2 = sshll.u32 %s1422_s23, 4  ;;  %s105_s2 = int_to_ptr.vmem [resolvable:$true] %s104_s2 }
  0x22   :  { %s1284_s22 = scalar_lea.vmem %s105_s2, 2048  ;;  %p1289_p11 = scmp.lt.s32.totalorder %s105_s2, %s105_s2 }
  0x23   :  { %p1285_p10 = scmp.ne.s32.totalorder %s105_s2, %s1284_s22  ;;  %p1290_p12 = scmp.lt.s32.totalorder %s1284_s22, %s1284_s22 }
  0x25   :  { %p1291_p13 = por %p1290_p12, %p1289_p11 }
  0x26   :  { %s37_s1 = sshll.u32 %s1758_s21, 4  ;;  %s38_s1 = int_to_ptr.vmem [resolvable:$true] %s37_s1 }
  0x27   :  { %p1292_p0 = pnand %p1291_p13, %p1285_p10 }
  0x29   :  { %1295 = shalt.err (!%p1292_p0)
}
  0x2a   :  { %s1423_s25 = smov 128   ;;  %s1424_s3 = smov 8  }
  0x2b   :  { %110 = dma.hbm_to_vmem [thread:$0]  %s1738_s8, 2048, %s105_s2, [#allocation14], %s1423_s25, %s1423_s25, %s1424_s3  }
  0x2c   :  { %s1296_s26 = scalar_lea.vmem %s38_s1, 32  ;;  %p1301_p2 = scmp.lt.s32.totalorder %s38_s1, %s38_s1 }
  0x2d   :  { %p1297_p1 = scmp.ne.s32.totalorder %s38_s1, %s1296_s26  ;;  %p1302_p3 = scmp.lt.s32.totalorder %s1296_s26, %s1296_s26 }
  0x2f   :  { %p1303_p4 = por %p1302_p3, %p1301_p2 }
  0x31   :  { %p1304_p5 = pnand %p1303_p4, %p1297_p1 }
  0x33   :  { %1307 = shalt.err (!%p1304_p5)
}
  0x34   :  { %s1425_s27 = smov [#allocation3]   ;;  %s1426_s28 = smov [#allocation6]  }
  0x35   :  { %40 = dma.vmem_to_smem %s38_s1, 32, %s1425_s27, [#allocation5]  }
  0x36   :  { %s47_s4 = sshll.u32 %s1426_s28, 4  ;;  %s1427_s29 = smov [#allocation9]   ;;  %s48_s4 = int_to_ptr.vmem [resolvable:$true] %s47_s4 }
  0x37   :  { %s68_s30 = sshll.u32 %s1427_s29, 4  ;;  %s1316_s0 = scalar_lea.vmem %s48_s4, 128  ;;  %s69_s30 = int_to_ptr.vmem [resolvable:$true] %s68_s30 }
  0x38   :  { %p1317_p6 = scmp.ne.s32.totalorder %s48_s4, %s1316_s0  ;;  %p1321_p7 = scmp.lt.s32.totalorder %s48_s4, %s48_s4 }
  0x39   :  { %p1322_p8 = scmp.lt.s32.totalorder %s1316_s0, %s1316_s0 }
  0x3b   :  { %p1323_p9 = por %p1322_p8, %p1321_p7 }
  0x3d   :  { %p1324_p10 = pnand %p1323_p9, %p1317_p6 }
  0x3f   :  { %1327 = shalt.err (!%p1324_p10)
}
  0x40   :  { %s1759_s23 = sld [smem:[#allocation25_spill]]  ;;  %s1336_s2 = scalar_lea.vmem %s69_s30, 2048 }
  0x41   :  { %p1337_p11 = scmp.ne.s32.totalorder %s69_s30, %s1336_s2  ;;  %p1341_p12 = scmp.lt.s32.totalorder %s69_s30, %s69_s30 }
  0x42   :  { %p1342_p13 = scmp.lt.s32.totalorder %s1336_s2, %s1336_s2 }
  0x44   :  { %p1343_p0 = por %p1342_p13, %p1341_p12 }
  0x46   :  { %50 = dma.hbm_to_vmem [thread:$0]  %s1759_s23, 128, %s48_s4, [#allocation4]  }
  0x47   :  { %p1344_p1 = pnand %p1343_p0, %p1337_p11 }
  0x49   :  { %1347 = shalt.err (!%p1344_p1)
}
  0x4a   :  { %s1760_s5 = sld [smem:[#allocation28_spill]]  ;;  %s1428_s24 = smov [#allocation12]  }
  0x4b   :  { %s90_s26 = sshll.u32 %s1428_s24, 4  ;;  %s1429_s27 = smov [#allocation15]   ;;  %s91_s26 = int_to_ptr.vmem [resolvable:$true] %s90_s26 }
  0x4c   :  { %s118_s28 = sshll.u32 %s1429_s27, 4  ;;  %s1356_s4 = scalar_lea.vmem %s91_s26, 2048  ;;  %s119_s28 = int_to_ptr.vmem [resolvable:$true] %s118_s28 }
  0x4d   :  { %p1357_p2 = scmp.ne.s32.totalorder %s91_s26, %s1356_s4  ;;  %p1361_p3 = scmp.lt.s32.totalorder %s91_s26, %s91_s26 }
  0x4e   :  { %p1362_p4 = scmp.lt.s32.totalorder %s1356_s4, %s1356_s4 }
  0x50   :  { %74 = dma.hbm_to_vmem [thread:$0]  %s1760_s5, 2048, %s69_s30, [#allocation8], %s1423_s25, %s1423_s25, %s1424_s3  }
  0x51   :  { %p1363_p5 = por %p1362_p4, %p1361_p3 }
  0x53   :  { %p1364_p6 = pnand %p1363_p5, %p1357_p2 }
  0x55   :  { %1367 = shalt.err (!%p1364_p6)
}
  0x56   :  { %96 = dma.hbm_to_vmem [thread:$0]  %s1736_s6, 2048, %s91_s26, [#allocation11], %s1423_s25, %s1423_s25, %s1424_s3  }
  0x57   :  { %s1376_s30 = scalar_lea.vmem %s119_s28, 2048  ;;  %p1381_p8 = scmp.lt.s32.totalorder %s119_s28, %s119_s28 }
  0x58   :  { %p1377_p7 = scmp.ne.s32.totalorder %s119_s28, %s1376_s30  ;;  %p1382_p9 = scmp.lt.s32.totalorder %s1376_s30, %s1376_s30 }
  0x5a   :  { %p1383_p10 = por %p1382_p9, %p1381_p8 }
  0x5c   :  { %p1384_p11 = pnand %p1383_p10, %p1377_p7 }
  0x5e   :  { %1387 = shalt.err (!%p1384_p11)
}
  0x5f   :  { %124 = dma.hbm_to_vmem [thread:$0]  %s1740_s10, 2048, %s119_s28, [#allocation14], %s1423_s25, %s1423_s25, %s1424_s3  }
  0x60   :  { %s1430_s23 = smov [#allocation16]  }
  0x61   :  { %s138_s2 = sshll.u32 %s1430_s23, 4  ;;  %s139_s2 = int_to_ptr.vmem [resolvable:$true] %s138_s2 }
  0x62   :  { %s1396_s1 = scalar_lea.vmem %s139_s2, 2048  ;;  %p1401_p13 = scmp.lt.s32.totalorder %s139_s2, %s139_s2 }
  0x63   :  { %p1397_p12 = scmp.ne.s32.totalorder %s139_s2, %s1396_s1  ;;  %p1402_p0 = scmp.lt.s32.totalorder %s1396_s1, %s1396_s1 }
  0x65   :  { %p1403_p1 = por %p1402_p0, %p1401_p13 }
  0x67   :  { %p1404_p2 = pnand %p1403_p1, %p1397_p12 }
  0x69   :  { %1407 = shalt.err (!%p1404_p2)
}
  0x6a   :  { %144 = dma.hbm_to_vmem [thread:$0]  %s1745_s15, 2048, %s139_s2, [#allocation17], %s1423_s25, %s1423_s25, %s1424_s3  }
  0x6b   :  { %1408 = dma.done.wait [#allocation5], 32  }
  0x6c   :  { %1409 = vsyncadd [#allocation5], 4294967264 }
  0x6d   :  { %1410 = dma.done.wait [#allocation4], 128  }
  0x6e   :  { %1411 = vsyncadd [#allocation4], 4294967168 }
  0x6f   :  { %1412 = dma.done.wait [#allocation8], 2176  }
  0x70   :  { %1413 = vsyncadd [#allocation8], 4294965120 }
  0x71   :  { %1414 = dma.done.wait [#allocation11], 2064  }
  0x72   :  { %1415 = vsyncadd [#allocation11], 4294965232 }
  0x73   :  { %1416 = dma.done.wait [#allocation14], 4096  }
  0x74   :  { %1417 = vsyncadd [#allocation14], 4294963200 }
  0x75   :  { %1418 = dma.done.wait [#allocation17], 2048  }
  0x76   :  { %1419 = vsyncadd [#allocation17], 4294965248 }
  0x77   :  { %180 = sfence }
  0x78   :  { %v222_v0 = vld [vmem:[#allocation9 + $0x78] sm:$0xff]  ;;  %v1431_v1 = vmov 0.0   ;;  %v221_v2 = vld [vmem:[#allocation9 + $0x70] sm:$0xff]  ;;  %vm1432_vm0 = vmmov 0   ;;  %s182_s10 = sld [smem:[#allocation3]]  ;;  %v220_v3 = vld [vmem:[#allocation9 + $0x68] sm:$0xff] }
  0x79   :  { %997 = vmatprep.subr.mxu0 %v1431_v1  ;;  %181 = vst [vmem:[#allocation2] sm:$0xff] %v1431_v1  ;;  %1029 = vmatprep.mubr.msk.f32.mxu0 %vm1432_vm0, %v1431_v1  ;;  %s894_s15 = sld [smem:[#allocation3 + $0x1]]  ;;  %v219_v4 = vld [vmem:[#allocation9 + $0x60] sm:$0xff]  ;;  %v315_v6 = vld [vmem:[#allocation12 + $0x70] sm:$0xff]  ;;  %v314_v8 = vld [vmem:[#allocation12 + $0x68] sm:$0xff] }
  0x7a   :  { %998 = vmatpush3.msra.mxu0 %v222_v0  ;;  %1032 = vmatprep.subr.mxu1 %v1431_v1  ;;  %s1587_s25 = sld [smem:[#allocation3 + $0x2]]  ;;  %v316_v5 = vld [vmem:[#allocation12 + $0x78] sm:$0xff]  ;;  %v217_v10 = vld [vmem:[#allocation9 + $0x50] sm:$0xff]  ;;  %v313_v12 = vld [vmem:[#allocation12 + $0x60] sm:$0xff] }
  0x7b   :  { %999 = vmatprep.subr.mxu0 %v1431_v1  ;;  %1064 = vmatprep.mubr.msk.f32.mxu1 %vm1432_vm0, %v1431_v1  ;;  %s1591_s3 = sld [smem:[#allocation3 + $0x80]]  ;;  %v218_v7 = vld [vmem:[#allocation9 + $0x58] sm:$0xff]  ;;  %v216_v15 = vld [vmem:[#allocation9 + $0x48] sm:$0xff]  ;;  %v215_v20 = vld [vmem:[#allocation9 + $0x40] sm:$0xff] }
  0x7c   :  { %1000 = vmatpush3.msra.mxu0 %v221_v2  ;;  %s1594_s5 = sld [smem:[#allocation3 + $0x81]]  ;;  %1033 = vmatpush3.msra.mxu1 %v316_v5  ;;  %v312_v17 = vld [vmem:[#allocation12 + $0x58] sm:$0xff]  ;;  %v311_v23 = vld [vmem:[#allocation12 + $0x50] sm:$0xff]  ;;  %v310_v26 = vld [vmem:[#allocation12 + $0x48] sm:$0xff] }
  0x7d   :  { %1001 = vmatprep.subr.mxu0 %v1431_v1  ;;  %s1596_s24 = sld [smem:[#allocation3 + $0x82]]  ;;  %1034 = vmatprep.subr.mxu1 %v1431_v1  ;;  %v214_v24 = vld [vmem:[#allocation9 + $0x38] sm:$0xff]  ;;  %v213_v27 = vld [vmem:[#allocation9 + $0x30] sm:$0xff]  ;;  %v309_v28 = vld [vmem:[#allocation12 + $0x40] sm:$0xff] }
  0x7e   :  { %1002 = vmatpush3.msra.mxu0 %v220_v3  ;;  %s183_s26 = scalar_lea.vmem [#allocation6], %s182_s10  ;;  %1035 = vmatpush3.msra.mxu1 %v315_v6  ;;  %s1761_s29 = sld [smem:[#allocation27_spill]]  ;;  %v212_v29 = vld [vmem:[#allocation9 + $0x28] sm:$0xff]  ;;  %v308_v30 = vld [vmem:[#allocation12 + $0x38] sm:$0xff]  ;;  %v307_v32 = vld [vmem:[#allocation12 + $0x30] sm:$0xff] }
  0x7f   :  { %1003 = vmatprep.subr.mxu0 %v1431_v1  ;;  %v184_v9 = vld [vmem:[%s183_s26] sm:$0x1]  ;;  %s186_s27 = scalar_lea.vmem [#allocation7], %s894_s15  ;;  %1036 = vmatprep.subr.mxu1 %v1431_v1  ;;  %v211_v31 = vld [vmem:[#allocation9 + $0x20] sm:$0xff]  ;;  %v210_v33 = vld [vmem:[#allocation9 + $0x18] sm:$0xff] }
  0x80   :  { %1004 = vmatpush3.msra.mxu0 %v219_v4  ;;  %v187_v11 = vld [vmem:[%s186_s27] sm:$0x1]  ;;  %1037 = vmatpush3.msra.mxu1 %v314_v8  ;;  %v306_v34 = vld [vmem:[#allocation12 + $0x28] sm:$0xff]  ;;  %v304_v38 = vld [vmem:[#allocation12 + $0x18] sm:$0xff] }
  0x81   :  { %1005 = vmatprep.subr.mxu0 %v1431_v1  ;;  %v188_v13 = vadd.f32 %v187_v11, %v184_v9  ;;  %s195_s30 = scalar_lea.vmem [#allocation6], %s1591_s3  ;;  %1038 = vmatprep.subr.mxu1 %v1431_v1  ;;  %v209_v35 = vld [vmem:[#allocation9 + $0x10] sm:$0xff]  ;;  %v305_v36 = vld [vmem:[#allocation12 + $0x20] sm:$0xff]  ;;  %v410_v44 = vld [vmem:[#allocation13 + $0x78] sm:$0xff] }
  0x82   :  { %1006 = vmatpush3.msra.mxu0 %v218_v7  ;;  %v196_v16 = vld [vmem:[%s195_s30] sm:$0x1]  ;;  %s198_s8 = scalar_lea.vmem [#allocation7], %s1594_s5  ;;  %1039 = vmatpush3.msra.mxu1 %v313_v12  ;;  %v207_v39 = vld [vmem:[#allocation9] sm:$0xff]  ;;  %v303_v41 = vld [vmem:[#allocation12 + $0x10] sm:$0xff] }
  0x83   :  { %1007 = vmatprep.subr.mxu0 %v1431_v1  ;;  %v199_v19 = vld [vmem:[%s198_s8] sm:$0x1]  ;;  %1040 = vmatprep.subr.mxu1 %v1431_v1  ;;  %v302_v42 = vld [vmem:[#allocation12 + $0x8] sm:$0xff]  ;;  %v409_v45 = vld [vmem:[#allocation13 + $0x70] sm:$0xff] }
  0x84   :  { %s190_s0 = scalar_lea.vmem %s1761_s29, %s1587_s25  ;;  %1008 = vmatpush3.msra.mxu0 %v217_v10  ;;  %s202_s2 = scalar_lea.vmem %s1761_s29, %s1596_s24  ;;  %v200_v21 = vadd.f32 %v199_v19, %v196_v16  ;;  %1041 = vmatpush3.msra.mxu1 %v312_v17  ;;  %v208_v37 = vld [vmem:[#allocation9 + $0x8] sm:$0xff]  ;;  %v406_v48 = vld [vmem:[#allocation13 + $0x58] sm:$0xff]  ;;  %v405_v49 = vld [vmem:[#allocation13 + $0x50] sm:$0xff] }
  0x85   :  { %v191_v14 = vld [vmem:[%s190_s0] sm:$0x1]  ;;  %1009 = vmatprep.subr.mxu0 %v1431_v1  ;;  %1042 = vmatprep.subr.mxu1 %v1431_v1  ;;  %v408_v46 = vld [vmem:[#allocation13 + $0x68] sm:$0xff]  ;;  %v402_v52 = vld [vmem:[#allocation13 + $0x38] sm:$0xff] }
  0x86   :  { %v192_v18 = vadd.f32 %v191_v14, %v188_v13  ;;  %v203_v22 = vld [vmem:[%s202_s2] sm:$0x1]  ;;  %1010 = vmatpush3.msra.mxu0 %v216_v15  ;;  %1043 = vmatpush3.msra.mxu1 %v311_v23  ;;  %v404_v50 = vld [vmem:[#allocation13 + $0x48] sm:$0xff]  ;;  %v401_v53 = vld [vmem:[#allocation13 + $0x30] sm:$0xff] }
  0x87   :  { %1011 = vmatprep.subr.mxu0 %v1431_v1  ;;  %v204_v25 = vadd.f32 %v203_v22, %v200_v21  ;;  %1044 = vmatprep.subr.mxu1 %v1431_v1  ;;  %v301_v43 = vld [vmem:[#allocation12] sm:$0xff]  ;;  %v400_v54 = vld [vmem:[#allocation13 + $0x28] sm:$0xff]  ;;  %v398_v56 = vld [vmem:[#allocation13 + $0x18] sm:$0xff] }
  0x88   :  { %193 = vst [vmem:[#allocation2] sm:$0x1] %v192_v18  ;;  %1012 = vmatpush3.msra.mxu0 %v215_v20  ;;  %1045 = vmatpush3.msra.mxu1 %v310_v26  ;;  %v407_v47 = vld [vmem:[#allocation13 + $0x60] sm:$0xff]  ;;  %v899_v57 = vld [vmem:[#allocation10] ss:$0 sm:$0xff]  ;;  %v397_v62 = vld [vmem:[#allocation13 + $0x10] sm:$0xff] }
  0x89   :  { %1013 = vmatprep.subr.mxu0 %v1431_v1  ;;  %205 = vst [vmem:[#allocation2 + $0x1] sm:$0x1] %v204_v25  ;;  %1046 = vmatprep.subr.mxu1 %v1431_v1  ;;  %v403_v51 = vld [vmem:[#allocation13 + $0x40] sm:$0xff]  ;;  %v396_v63 = vld [vmem:[#allocation13 + $0x8] sm:$0xff]  ;;  %v513_v12 = vld [vmem:[#allocation15 + $0x78] sm:$0xff] }
  0x8a   :  { %1014 = vmatpush3.msra.mxu0 %v214_v24  ;;  %1047 = vmatpush3.msra.mxu1 %v309_v28  ;;  %v399_v55 = vld [vmem:[#allocation13 + $0x20] sm:$0xff]  ;;  %v512_v13 = vld [vmem:[#allocation15 + $0x70] sm:$0xff]  ;;  %v511_v14 = vld [vmem:[#allocation15 + $0x68] sm:$0xff] }
  0x8b   :  { %1015 = vmatprep.subr.mxu0 %v1431_v1  ;;  %1048 = vmatprep.subr.mxu1 %v1431_v1  ;;  %v395_v0 = vld [vmem:[#allocation13] sm:$0xff]  ;;  %v509_v16 = vld [vmem:[#allocation15 + $0x58] sm:$0xff]  ;;  %v508_v17 = vld [vmem:[#allocation15 + $0x50] sm:$0xff] }
  0x8c   :  { %1016 = vmatpush3.msra.mxu0 %v213_v27  ;;  %1049 = vmatpush3.msra.mxu1 %v308_v30  ;;  %v900_v2 = vld [vmem:[%s1737_s7] ss:$0 sm:$0xff]  ;;  %v507_v18 = vld [vmem:[#allocation15 + $0x48] sm:$0xff]  ;;  %v505_v20 = vld [vmem:[#allocation15 + $0x38] sm:$0xff] }
  0x8d   :  { %1017 = vmatprep.subr.mxu0 %v1431_v1  ;;  %1050 = vmatprep.subr.mxu1 %v1431_v1  ;;  %v901_v7 = vld [vmem:[%s1739_s9] ss:$0 sm:$0xff]  ;;  %v504_v21 = vld [vmem:[#allocation15 + $0x30] sm:$0xff]  ;;  %v503_v22 = vld [vmem:[#allocation15 + $0x28] sm:$0xff] }
  0x8e   :  { %1018 = vmatpush3.msra.mxu0 %v212_v29  ;;  %1051 = vmatpush3.msra.mxu1 %v307_v32  ;;  %v510_v15 = vld [vmem:[#allocation15 + $0x60] sm:$0xff]  ;;  %v501_v24 = vld [vmem:[#allocation15 + $0x18] sm:$0xff]  ;;  %v500_v25 = vld [vmem:[#allocation15 + $0x10] sm:$0xff] }
  0x8f   :  { %1019 = vmatprep.subr.mxu0 %v1431_v1  ;;  %1052 = vmatprep.subr.mxu1 %v1431_v1  ;;  %v506_v19 = vld [vmem:[#allocation15 + $0x40] sm:$0xff]  ;;  %v499_v26 = vld [vmem:[#allocation15 + $0x8] sm:$0xff] }
  0x90   :  { %1020 = vmatpush3.msra.mxu0 %v211_v31  ;;  %1053 = vmatpush3.msra.mxu1 %v306_v34  ;;  %v206_v40 = vld [vmem:[#allocation2] sm:$0xff] }
  0x91   :  { %1021 = vmatprep.subr.mxu0 %v1431_v1  ;;  %1054 = vmatprep.subr.mxu1 %v1431_v1  ;;  %v502_v23 = vld [vmem:[#allocation15 + $0x20] sm:$0xff] }
  0x92   :  { %1022 = vmatpush3.msra.mxu0 %v210_v33  ;;  %1055 = vmatpush3.msra.mxu1 %v305_v36  ;;  %v498_v27 = vld [vmem:[#allocation15] sm:$0xff] }
  0x93   :  { %1023 = vmatprep.subr.mxu0 %v1431_v1  ;;  %1056 = vmatprep.subr.mxu1 %v1431_v1 }
  0x94   :  { %1024 = vmatpush3.msra.mxu0 %v209_v35  ;;  %1057 = vmatpush3.msra.mxu1 %v304_v38 }
  0x95   :  { %1025 = vmatprep.subr.mxu0 %v1431_v1  ;;  %1058 = vmatprep.subr.mxu1 %v1431_v1 }
  0x96   :  { %1026 = vmatpush3.msra.mxu0 %v208_v37  ;;  %1059 = vmatpush3.msra.mxu1 %v303_v41  ;;  %v902_v41 = vld [vmem:[%s1742_s12] ss:$0 sm:$0xff] }
  0x97   :  { %1027 = vmatprep.subr.mxu0 %v1431_v1  ;;  %1060 = vmatprep.subr.mxu1 %v1431_v1 }
  0x98   :  { %1028 = vmatpush3.msra.mxu0 %v207_v39  ;;  %1061 = vmatpush3.msra.mxu1 %v302_v42 }
  0x99   :  { %1030 = vmatmul.mubr.f32.vlgmr.msra.gmra.mxu0 %v206_v40  ;;  %1067 = vmatprep.subr.mxu0 %v1431_v1 }
  0x9a   :  { %1099 = vmatprep.mubr.msk.f32.mxu0 %vm1432_vm0, %v1431_v1  ;;  %1062 = vmatprep.subr.mxu1 %v1431_v1 }
  0x9b   :  { %1063 = vmatpush3.msra.mxu1 %v301_v43  ;;  %1068 = vmatpush3.msra.mxu0 %v410_v44  ;;  %v903_v43 = vld [vmem:[%s1743_s13] ss:$0 sm:$0xff] }
  0x9c   :  { %1102 = vmatprep.subr.mxu1 %v1431_v1  ;;  %1069 = vmatprep.subr.mxu0 %v1431_v1 }
  0x9d   :  { %1070 = vmatpush3.msra.mxu0 %v409_v45  ;;  %v905_v45 = vld [vmem:[%s1744_s14] ss:$0 sm:$0xff] }
  0x9e   :  { %1071 = vmatprep.subr.mxu0 %v1431_v1 }
  0x9f   :  { %1072 = vmatpush3.msra.mxu0 %v408_v46 }
  0xa0   :  { %1073 = vmatprep.subr.mxu0 %v1431_v1 }
  0xa1   :  { %1074 = vmatpush3.msra.mxu0 %v407_v47 }
  0xa2   :  { %1075 = vmatprep.subr.mxu0 %v1431_v1 }
  0xa3   :  { %1076 = vmatpush3.msra.mxu0 %v406_v48 }
  0xa4   :  { %1077 = vmatprep.subr.mxu0 %v1431_v1 }
  0xa5   :  { %1078 = vmatpush3.msra.mxu0 %v405_v49 }
  0xa6   :  { %1079 = vmatprep.subr.mxu0 %v1431_v1 }
  0xa7   :  { %1080 = vmatpush3.msra.mxu0 %v404_v50 }
  0xa8   :  { %1081 = vmatprep.subr.mxu0 %v1431_v1 }
  0xa9   :  { %1082 = vmatpush3.msra.mxu0 %v403_v51 }
  0xaa   :  { %1083 = vmatprep.subr.mxu0 %v1431_v1 }
  0xab   :  { %1084 = vmatpush3.msra.mxu0 %v402_v52 }
  0xac   :  { %1085 = vmatprep.subr.mxu0 %v1431_v1 }
  0xad   :  { %1086 = vmatpush3.msra.mxu0 %v401_v53 }
  0xae   :  { %1087 = vmatprep.subr.mxu0 %v1431_v1 }
  0xaf   :  { %1088 = vmatpush3.msra.mxu0 %v400_v54 }
  0xb0   :  { %1089 = vmatprep.subr.mxu0 %v1431_v1 }
  0xb1   :  { %1090 = vmatpush3.msra.mxu0 %v399_v55 }
  0xb2   :  { %1091 = vmatprep.subr.mxu0 %v1431_v1 }
  0xb3   :  { %1092 = vmatpush3.msra.mxu0 %v398_v56 }
  0xb4   :  { %1093 = vmatprep.subr.mxu0 %v1431_v1 }
  0xb5   :  { %1094 = vmatpush3.msra.mxu0 %v397_v62 }
  0xb6   :  { %1095 = vmatprep.subr.mxu0 %v1431_v1 }
  0xb7   :  { %1096 = vmatpush3.msra.mxu0 %v396_v63  ;;  %v906_v63 = vld [vmem:[%s1741_s11] ss:$0 sm:$0xff] }
  0xb8   :  { %1097 = vmatprep.subr.mxu0 %v1431_v1 }
  0xb9   :  { %1098 = vmatpush3.msra.mxu0 %v395_v0  ;;  %v1433_v0 = vmov -1.0  }
  0xba   :  { %1137 = vmatprep.subr.mxu0 %v1431_v1 }
 0x159   :  { %v296_v58 = vpop.f32.mrf.mxu0 }
 0x15a   :  { %v297_v59 = vadd.f32 %v899_v57, %v296_v58 }
 0x15b   :  { %v1031_v60 = vpop.f32.mrf.mxu0 }
 0x15c   :  { %v300_v61 = vmax.f32 %v297_v59, 0.0 }
 0x15e   :  { %1065 = vmatmul.mubr.f32.vlgmr.msra.gmra.mxu1 %v300_v61 }
 0x15f   :  { %1134 = vmatprep.mubr.msk.f32.mxu1 %vm1432_vm0, %v1431_v1  ;;  %1103 = vmatpush3.msra.mxu1 %v513_v12 }
 0x160   :  { %1104 = vmatprep.subr.mxu1 %v1431_v1 }
 0x161   :  { %1105 = vmatpush3.msra.mxu1 %v512_v13 }
 0x162   :  { %1106 = vmatprep.subr.mxu1 %v1431_v1 }
 0x163   :  { %1107 = vmatpush3.msra.mxu1 %v511_v14 }
 0x164   :  { %1108 = vmatprep.subr.mxu1 %v1431_v1 }
 0x165   :  { %1109 = vmatpush3.msra.mxu1 %v510_v15 }
 0x166   :  { %1110 = vmatprep.subr.mxu1 %v1431_v1 }
 0x167   :  { %1111 = vmatpush3.msra.mxu1 %v509_v16 }
 0x168   :  { %1112 = vmatprep.subr.mxu1 %v1431_v1 }
 0x169   :  { %1113 = vmatpush3.msra.mxu1 %v508_v17 }
 0x16a   :  { %1114 = vmatprep.subr.mxu1 %v1431_v1 }
 0x16b   :  { %1115 = vmatpush3.msra.mxu1 %v507_v18 }
 0x16c   :  { %1116 = vmatprep.subr.mxu1 %v1431_v1 }
 0x16d   :  { %1117 = vmatpush3.msra.mxu1 %v506_v19 }
 0x16e   :  { %1118 = vmatprep.subr.mxu1 %v1431_v1 }
 0x16f   :  { %1119 = vmatpush3.msra.mxu1 %v505_v20 }
 0x170   :  { %1120 = vmatprep.subr.mxu1 %v1431_v1 }
 0x171   :  { %1121 = vmatpush3.msra.mxu1 %v504_v21 }
 0x172   :  { %1122 = vmatprep.subr.mxu1 %v1431_v1 }
 0x173   :  { %1123 = vmatpush3.msra.mxu1 %v503_v22 }
 0x174   :  { %1124 = vmatprep.subr.mxu1 %v1431_v1 }
 0x175   :  { %1125 = vmatpush3.msra.mxu1 %v502_v23 }
 0x176   :  { %1126 = vmatprep.subr.mxu1 %v1431_v1 }
 0x177   :  { %1127 = vmatpush3.msra.mxu1 %v501_v24 }
 0x178   :  { %1128 = vmatprep.subr.mxu1 %v1431_v1 }
 0x179   :  { %1129 = vmatpush3.msra.mxu1 %v500_v25 }
 0x17a   :  { %1130 = vmatprep.subr.mxu1 %v1431_v1 }
 0x17b   :  { %1131 = vmatpush3.msra.mxu1 %v499_v26 }
 0x17c   :  { %1132 = vmatprep.subr.mxu1 %v1431_v1 }
 0x17d   :  { %1133 = vmatpush3.msra.mxu1 %v498_v27 }
 0x21e   :  { %v390_v3 = vpop.f32.mrf.mxu1 }
 0x21f   :  { %v391_v4 = vadd.f32 %v900_v2, %v390_v3 }
 0x220   :  { %v1066_v5 = vpop.f32.mrf.mxu1 }
 0x221   :  { %v394_v6 = vmax.f32 %v391_v4, 0.0 }
 0x223   :  { %1100 = vmatmul.mubr.f32.vlgmr.msra.gmra.mxu0 %v394_v6 }
 0x224   :  { %1169 = vmatprep.mubr.msk.f32.mxu0 %vm1432_vm0, %v1431_v1 }
 0x2e3   :  { %v484_v8 = vpop.f32.mrf.mxu0 }
 0x2e4   :  { %v485_v9 = vadd.f32 %v901_v7, %v484_v8 }
 0x2e5   :  { %v1101_v10 = vpop.f32.mrf.mxu0 }
 0x2e6   :  { %v488_v11 = vmul.f32 %v485_v9, %v485_v9 }
 0x2e8   :  { %489 = vadd.xlane.f32.xlu0 %v488_v11 }
 0x371   :  { %v490_v28 = vpop.xlane.xlu0 %489 }
 0x372   :  { %v491_v29 = vadd.f32 1e-30, %v490_v28 }
 0x374   :  { %1186 = vrsqrt.f32 %v491_v29 }
 0x381   :  { %v1187_v30 = vpop.eup %1186 }
 0x382   :  { %v493_v31 = vmul.f32 %v1187_v30, %v490_v28 }
 0x384   :  { %1188 = vtanh.f32 %v493_v31 }
 0x391   :  { %v1189_v32 = vpop.eup %1188 }
 0x392   :  { %v495_v33 = vmin.f32 %v1189_v32, 0.996 }
 0x394   :  { %v496_v34 = vmul.f32 %v1187_v30, %v495_v33 }
 0x396   :  { %v497_v35 = vmul.f32 %v496_v34, %v485_v9 }
 0x398   :  { %1135 = vmatmul.mubr.f32.vlgmr.msra.gmra.mxu1 %v497_v35  ;;  %v518_v36 = vmul.f32 %v497_v35, %v497_v35  ;;  %v716_v35 = vld [vmem:[#allocation16 + $0x78] sm:$0xff] }
 0x399   :  { %1138 = vmatpush3.msra.mxu0 %v716_v35 }
 0x39a   :  { %519 = vadd.xlane.f32.xlu0 %v518_v36  ;;  %1139 = vmatprep.subr.mxu0 %v1431_v1  ;;  %v715_v36 = vld [vmem:[#allocation16 + $0x70] sm:$0xff] }
 0x39b   :  { %1140 = vmatpush3.msra.mxu0 %v715_v36 }
 0x39c   :  { %1141 = vmatprep.subr.mxu0 %v1431_v1 }
 0x423   :  { %v520_v37 = vpop.xlane.xlu0 %519 }
 0x424   :  { %v521_v38 = vsub.f32 1.0, %v520_v37  ;;  %v714_v37 = vld [vmem:[#allocation16 + $0x68] sm:$0xff] }
 0x425   :  { %1142 = vmatpush3.msra.mxu0 %v714_v37  ;;  %v911_v37 = vld [vmem:[%s1746_s16] ss:$0 sm:$0xff] }
 0x426   :  { %1190 = vrcp.f32 %v521_v38  ;;  %1143 = vmatprep.subr.mxu0 %v1431_v1  ;;  %v713_v38 = vld [vmem:[#allocation16 + $0x60] sm:$0xff] }
 0x427   :  { %1144 = vmatpush3.msra.mxu0 %v713_v38 }
 0x428   :  { %1145 = vmatprep.subr.mxu0 %v1431_v1 }
 0x433   :  { %v1191_v39 = vpop.eup %1190 }
 0x434   :  { %v523_v40 = vmul.f32 2.0, %v1191_v39  ;;  %v712_v39 = vld [vmem:[#allocation16 + $0x58] sm:$0xff] }
 0x435   :  { %1146 = vmatpush3.msra.mxu0 %v712_v39 }
 0x436   :  { %v600_v42 = vmul.f32 %v902_v41, %v523_v40  ;;  %v904_v44 = vadd.f32 -1.0, %v523_v40  ;;  %1147 = vmatprep.subr.mxu0 %v1431_v1  ;;  %v711_v40 = vld [vmem:[#allocation16 + $0x50] sm:$0xff]  ;;  %v710_v41 = vld [vmem:[#allocation16 + $0x48] sm:$0xff] }
 0x437   :  { %1148 = vmatpush3.msra.mxu0 %v711_v40 }
 0x438   :  { %v607_v46 = vmul.f32 %v903_v43, %v600_v42  ;;  %v616_v49 = vmul.f32 %v905_v45, %v904_v44  ;;  %1149 = vmatprep.subr.mxu0 %v1431_v1  ;;  %v709_v42 = vld [vmem:[#allocation16 + $0x40] sm:$0xff]  ;;  %v708_v43 = vld [vmem:[#allocation16 + $0x38] sm:$0xff]  ;;  %v707_v44 = vld [vmem:[#allocation16 + $0x30] sm:$0xff] }
 0x439   :  { %1150 = vmatpush3.msra.mxu0 %v710_v41  ;;  %v706_v45 = vld [vmem:[#allocation16 + $0x28] sm:$0xff] }
 0x43a   :  { %1151 = vmatprep.subr.mxu0 %v1431_v1 }
 0x43b   :  { %1152 = vmatpush3.msra.mxu0 %v709_v42 }
 0x43c   :  { %1153 = vmatprep.subr.mxu0 %v1431_v1 }
 0x43d   :  { %1154 = vmatpush3.msra.mxu0 %v708_v43 }
 0x43e   :  { %1155 = vmatprep.subr.mxu0 %v1431_v1 }
 0x43f   :  { %1156 = vmatpush3.msra.mxu0 %v707_v44 }
 0x440   :  { %1157 = vmatprep.subr.mxu0 %v1431_v1 }
 0x441   :  { %1158 = vmatpush3.msra.mxu0 %v706_v45 }
 0x442   :  { %1159 = vmatprep.subr.mxu0 %v1431_v1 }
 0x458   :  { %v590_v47 = vpop.f32.mrf.mxu1 }
 0x459   :  { %v608_v48 = vmul.f32 %v607_v46, %v590_v47  ;;  %v705_v46 = vld [vmem:[#allocation16 + $0x20] sm:$0xff]  ;;  %v704_v47 = vld [vmem:[#allocation16 + $0x18] sm:$0xff] }
 0x45a   :  { %v1136_v50 = vpop.f32.mrf.mxu1  ;;  %1160 = vmatpush3.msra.mxu0 %v705_v46 }
 0x45b   :  { %v617_v51 = vsub.f32 %v608_v48, %v616_v49  ;;  %1161 = vmatprep.subr.mxu0 %v1431_v1  ;;  %v703_v48 = vld [vmem:[#allocation16 + $0x10] sm:$0xff]  ;;  %v702_v49 = vld [vmem:[#allocation16 + $0x8] sm:$0xff]  ;;  %v701_v50 = vld [vmem:[#allocation16] sm:$0xff] }
 0x45c   :  { %1162 = vmatpush3.msra.mxu0 %v704_v47 }
 0x45d   :  { %v620_v52 = vand.u32 2147483647, %v617_v51  ;;  %vm618_vm3 = vcmp.ge.f32.partialorder %v617_v51, 0.0  ;;  %1163 = vmatprep.subr.mxu0 %v1431_v1 }
 0x45e   :  { %v619_v2 = vsel %vm618_vm3, 1.0, %v1433_v0  ;;  %1164 = vmatpush3.msra.mxu0 %v703_v48 }
 0x45f   :  { %v621_v53 = vmul.f32 %v620_v52, %v620_v52  ;;  %1165 = vmatprep.subr.mxu0 %v1431_v1 }
 0x460   :  { %1166 = vmatpush3.msra.mxu0 %v702_v49 }
 0x461   :  { %v622_v54 = vadd.f32 1.0, %v621_v53  ;;  %1167 = vmatprep.subr.mxu0 %v1431_v1 }
 0x462   :  { %1168 = vmatpush3.msra.mxu0 %v701_v50 }
 0x463   :  { %1192 = vrsqrt.f32 %v622_v54  ;;  %vm625_vm1 = vcmp.eq.f32.partialorder %v622_v54, inf  ;;  %v628_v57 = vand.u32 2147483648, %v622_v54  ;;  %vm627_vm2 = vcmp.eq.f32.partialorder %v622_v54, 0.0 }
 0x470   :  { %v1193_v55 = vpop.eup %1192 }
 0x471   :  { %v624_v56 = vmul.f32 %v1193_v55, %v622_v54 }
 0x473   :  { %v626_v58 = vsel %vm625_vm1, %v622_v54, %v624_v56 }
 0x474   :  { %v629_v59 = vsel %vm627_vm2, %v628_v57, %v626_v58 }
 0x475   :  { %v630_v60 = vadd.f32 %v629_v59, %v620_v52 }
 0x477   :  { %1194 = vlog2.f32 %v630_v60 }
 0x484   :  { %v1195_v61 = vpop.eup %1194 }
 0x485   :  { %v632_v62 = vmul.f32 0.6931472, %v1195_v61 }
 0x487   :  { %v633_v3 = vmul.f32 %v632_v62, %v619_v2 }
 0x489   :  { %v640_v4 = vmul.f32 %v906_v63, %v633_v3 }
 0x48b   :  { %v641_v5 = vmul.f32 1.442695, %v640_v4 }
 0x48d   :  { %1196 = vpow2.f32 %v641_v5 }
 0x49a   :  { %v1197_v6 = vpop.eup %1196 }
 0x49b   :  { %1198 = vrcp.f32 %v1197_v6 }
 0x4a8   :  { %v1199_v7 = vpop.eup %1198 }
 0x4a9   :  { %v644_v8 = vsub.f32 %v1197_v6, %v1199_v7 }
 0x4ab   :  { %v645_v9 = vmul.f32 0.5, %v644_v8 }
 0x4ad   :  { %v646_v10 = vmul.f32 %v645_v9, %v645_v9 }
 0x4af   :  { %647 = vadd.xlane.f32.xlu1 %v646_v10 }
 0x538   :  { %v648_v11 = vpop.xlane.xlu1 %647 }
 0x539   :  { %v649_v12 = vadd.f32 1.0, %v648_v11  ;;  %vm662_vm6 = vcmp.eq.f32.partialorder %v648_v11, inf  ;;  %v665_v22 = vand.u32 2147483648, %v648_v11  ;;  %vm664_vm7 = vcmp.eq.f32.partialorder %v648_v11, 0.0 }
 0x53b   :  { %1200 = vrsqrt.f32 %v649_v12  ;;  %vm652_vm4 = vcmp.eq.f32.partialorder %v649_v12, inf  ;;  %v655_v15 = vand.u32 2147483648, %v649_v12  ;;  %vm654_vm5 = vcmp.eq.f32.partialorder %v649_v12, 0.0 }
 0x53c   :  { %1202 = vrsqrt.f32 %v648_v11 }
 0x548   :  { %v1201_v13 = vpop.eup %1200 }
 0x549   :  { %v651_v14 = vmul.f32 %v1201_v13, %v649_v12  ;;  %v1203_v19 = vpop.eup %1202 }
 0x54a   :  { %v661_v20 = vmul.f32 %v1203_v19, %v648_v11  ;;  %v910_v19 = vld [vmem:[%s1749_s19] ss:$0 sm:$0xff] }
 0x54b   :  { %v653_v16 = vsel %vm652_vm4, %v649_v12, %v651_v14 }
 0x54c   :  { %v656_v17 = vsel %vm654_vm5, %v655_v15, %v653_v16  ;;  %v663_v21 = vsel %vm662_vm6, %v648_v11, %v661_v20  ;;  %v907_v15 = vld [vmem:[%s1747_s17] ss:$0 sm:$0xff] }
 0x54d   :  { %v657_v18 = vadd.f32 1.0, %v656_v17  ;;  %v666_v24 = vsel %vm664_vm7, %v665_v22, %v663_v21  ;;  %v908_v17 = vld [vmem:[%s1748_s18] ss:$0 sm:$0xff] }
 0x54f   :  { %1204 = vrcp.f32 %v657_v18 }
 0x55c   :  { %v1205_v23 = vpop.eup %1204 }
 0x55d   :  { %v667_v25 = vmul.f32 %v1205_v23, %v666_v24  ;;  %v659_v29 = vmul.f32 %v1205_v23, %v645_v9 }
 0x55f   :  { %v669_v26 = vmax.f32 %v667_v25, 1e-15  ;;  %vm668_vm8 = vcmp.gt.f32.partialorder %v667_v25, 0.996 }
 0x561   :  { %1206 = vrcp.f32 %v669_v26 }
 0x56e   :  { %v1207_v27 = vpop.eup %1206 }
 0x56f   :  { %v671_v28 = vmul.f32 0.996, %v1207_v27 }
 0x571   :  { %v672_v30 = vsel %vm668_vm8, %v671_v28, 1.0 }
 0x572   :  { %v673_v31 = vmul.f32 %v672_v30, %v659_v29 }
 0x574   :  { %v674_v32 = vmul.f32 %v673_v31, %v673_v31  ;;  %v1694_v33 = vmax.f32 %v673_v31, 0.0 }
 0x576   :  { %675 = vadd.xlane.f32.xlu1 %v674_v32  ;;  %v689_v34 = vmul.f32 %v1694_v33, %v1694_v33 }
 0x578   :  { %690 = vadd.xlane.f32.xlu0 %v689_v34 }
 0x5ff   :  { %v676_v51 = vpop.xlane.xlu1 %675 }
 0x600   :  { %v677_v52 = vadd.f32 1e-30, %v676_v51 }
 0x601   :  { %v691_v57 = vpop.xlane.xlu0 %690 }
 0x602   :  { %1208 = vrsqrt.f32 %v677_v52  ;;  %v692_v61 = vadd.f32 1e-30, %v691_v57 }
 0x60f   :  { %v1209_v53 = vpop.eup %1208 }
 0x610   :  { %v679_v54 = vmul.f32 %v1209_v53, %v676_v51 }
 0x612   :  { %v680_v55 = vmin.f32 %v679_v54, 0.9999999 }
 0x614   :  { %v682_v56 = vsub.f32 1.0, %v680_v55  ;;  %v681_v58 = vadd.f32 1.0, %v680_v55 }
 0x616   :  { %1210 = vrcp.f32 %v682_v56 }
 0x623   :  { %v1211_v59 = vpop.eup %1210 }
 0x624   :  { %v684_v60 = vmul.f32 %v1211_v59, %v681_v58 }
 0x626   :  { %1212 = vlog2.f32 %v684_v60 }
 0x627   :  { %1214 = vrsqrt.f32 %v692_v61 }
 0x633   :  { %v1213_v62 = vpop.eup %1212 }
 0x634   :  { %v686_v63 = vmul.f32 0.6931472, %v1213_v62  ;;  %v1215_v2 = vpop.eup %1214 }
 0x635   :  { %v694_v3 = vmul.f32 %v1215_v2, %v691_v57 }
 0x636   :  { %v687_v1 = vmul.f32 0.5, %v686_v63 }
 0x638   :  { %v695_v4 = vmul.f32 %v1209_v53, %v687_v1 }
 0x63a   :  { %v696_v5 = vmul.f32 %v695_v4, %v694_v3 }
 0x63c   :  { %1216 = vtanh.f32 %v696_v5 }
 0x649   :  { %v1217_v6 = vpop.eup %1216 }
 0x64a   :  { %v698_v7 = vmin.f32 %v1217_v6, 0.996 }
 0x64c   :  { %v699_v8 = vmul.f32 %v1215_v2, %v698_v7 }
 0x64e   :  { %v700_v9 = vmul.f32 %v699_v8, %v1694_v33 }
 0x650   :  { %1170 = vmatmul.mubr.f32.vlgmr.msra.gmra.mxu0 %v700_v9  ;;  %v721_v10 = vmul.f32 %v700_v9, %v700_v9 }
 0x652   :  { %722 = vadd.xlane.f32.xlu1 %v721_v10 }
 0x6db   :  { %v723_v11 = vpop.xlane.xlu1 %722 }
 0x6dc   :  { %v724_v12 = vsub.f32 1.0, %v723_v11 }
 0x6de   :  { %1218 = vrcp.f32 %v724_v12 }
 0x6eb   :  { %v1219_v13 = vpop.eup %1218 }
 0x6ec   :  { %v726_v14 = vmul.f32 2.0, %v1219_v13 }
 0x6ee   :  { %v803_v16 = vmul.f32 %v907_v15, %v726_v14  ;;  %v909_v18 = vadd.f32 -1.0, %v726_v14 }
 0x6f0   :  { %v810_v20 = vmul.f32 %v908_v17, %v803_v16  ;;  %v819_v23 = vmul.f32 %v910_v19, %v909_v18 }
 0x710   :  { %v793_v21 = vpop.f32.mrf.mxu0 }
 0x711   :  { %v811_v22 = vmul.f32 %v810_v20, %v793_v21 }
 0x712   :  { %v1171_v24 = vpop.f32.mrf.mxu0 }
 0x713   :  { %v820_v25 = vsub.f32 %v811_v22, %v819_v23 }
 0x715   :  { %v823_v26 = vand.u32 2147483647, %v820_v25  ;;  %vm821_vm11 = vcmp.ge.f32.partialorder %v820_v25, 0.0 }
 0x716   :  { %v822_v38 = vsel %vm821_vm11, 1.0, %v1433_v0 }
 0x717   :  { %v824_v27 = vmul.f32 %v823_v26, %v823_v26 }
 0x719   :  { %v825_v28 = vadd.f32 1.0, %v824_v27 }
 0x71b   :  { %1220 = vrsqrt.f32 %v825_v28  ;;  %vm828_vm9 = vcmp.eq.f32.partialorder %v825_v28, inf  ;;  %v831_v31 = vand.u32 2147483648, %v825_v28  ;;  %vm830_vm10 = vcmp.eq.f32.partialorder %v825_v28, 0.0 }
 0x728   :  { %v1221_v29 = vpop.eup %1220 }
 0x729   :  { %v827_v30 = vmul.f32 %v1221_v29, %v825_v28 }
 0x72b   :  { %v829_v32 = vsel %vm828_vm9, %v825_v28, %v827_v30 }
 0x72c   :  { %v832_v33 = vsel %vm830_vm10, %v831_v31, %v829_v32 }
 0x72d   :  { %v833_v34 = vadd.f32 %v832_v33, %v823_v26 }
 0x72f   :  { %1222 = vlog2.f32 %v833_v34 }
 0x73c   :  { %v1223_v35 = vpop.eup %1222 }
 0x73d   :  { %v835_v36 = vmul.f32 0.6931472, %v1223_v35 }
 0x73f   :  { %v836_v39 = vmul.f32 %v835_v36, %v822_v38 }
 0x741   :  { %v843_v40 = vmul.f32 %v911_v37, %v836_v39 }
 0x743   :  { %v844_v41 = vmul.f32 1.442695, %v843_v40 }
 0x745   :  { %1224 = vpow2.f32 %v844_v41 }
 0x752   :  { %v1225_v42 = vpop.eup %1224 }
 0x753   :  { %1226 = vrcp.f32 %v1225_v42 }
 0x760   :  { %v1227_v43 = vpop.eup %1226 }
 0x761   :  { %v847_v44 = vsub.f32 %v1225_v42, %v1227_v43 }
 0x763   :  { %v848_v45 = vmul.f32 0.5, %v847_v44 }
 0x765   :  { %v849_v46 = vmul.f32 %v848_v45, %v848_v45 }
 0x767   :  { %850 = vadd.xlane.f32.xlu0 %v849_v46 }
 0x7f0   :  { %v851_v47 = vpop.xlane.xlu0 %850 }
 0x7f1   :  { %v852_v48 = vadd.f32 1.0, %v851_v47  ;;  %vm865_vm14 = vcmp.eq.f32.partialorder %v851_v47, inf  ;;  %v868_v57 = vand.u32 2147483648, %v851_v47  ;;  %vm867_vm15 = vcmp.eq.f32.partialorder %v851_v47, 0.0 }
 0x7f3   :  { %1228 = vrsqrt.f32 %v852_v48  ;;  %vm855_vm12 = vcmp.eq.f32.partialorder %v852_v48, inf  ;;  %v858_v51 = vand.u32 2147483648, %v852_v48  ;;  %vm857_vm13 = vcmp.eq.f32.partialorder %v852_v48, 0.0 }
 0x7f4   :  { %1230 = vrsqrt.f32 %v851_v47 }
 0x800   :  { %v1229_v49 = vpop.eup %1228 }
 0x801   :  { %v854_v50 = vmul.f32 %v1229_v49, %v852_v48  ;;  %v1231_v54 = vpop.eup %1230 }
 0x802   :  { %v864_v55 = vmul.f32 %v1231_v54, %v851_v47 }
 0x803   :  { %v856_v0 = vsel %vm855_vm12, %v852_v48, %v854_v50 }
 0x804   :  { %v859_v52 = vsel %vm857_vm13, %v858_v51, %v856_v0  ;;  %v866_v56 = vsel %vm865_vm14, %v851_v47, %v864_v55 }
 0x805   :  { %v860_v53 = vadd.f32 1.0, %v859_v52  ;;  %v869_v59 = vsel %vm867_vm15, %v868_v57, %v866_v56 }
 0x807   :  { %1232 = vrcp.f32 %v860_v53 }
 0x814   :  { %v1233_v58 = vpop.eup %1232 }
 0x815   :  { %v870_v60 = vmul.f32 %v1233_v58, %v869_v59  ;;  %v862_v2 = vmul.f32 %v1233_v58, %v848_v45 }
 0x817   :  { %v872_v61 = vmax.f32 %v870_v60, 1e-15  ;;  %vm871_vm0 = vcmp.gt.f32.partialorder %v870_v60, 0.996 }
 0x819   :  { %1234 = vrcp.f32 %v872_v61 }
 0x826   :  { %v1235_v62 = vpop.eup %1234 }
 0x827   :  { %v874_v63 = vmul.f32 0.996, %v1235_v62 }
 0x829   :  { %v875_v1 = vsel %vm871_vm0, %v874_v63, 1.0 }
 0x82a   :  { %v876_v3 = vmul.f32 %v875_v1, %v862_v2 }
 0x82c   :  { %877 = vst [vmem:[%s1750_s20] sm:$0xff] %v876_v3 }
 0x82d   :  { %882 = vsyncpa [#allocation4], 1 }
 0x82e   :  { %883 = vsyncpa [#allocation8], 1 }
 0x82f   :  { %884 = vsyncpa [#allocation11], 1 }
 0x830   :  { %885 = vsyncpa [#allocation14], 1 }
 0x831   :  { %886 = vsyncpa [#allocation17], 1 }
 0x832   :  { %887 = vsyncpa [#allocation5], 1 }

</bundles_post_ra>
